<compile_context>
chip_gen: v7x
topology: tpu7x:2x2x1
jax: 0.10.0
libtpu: 0.0.40
codegen_flags: <defaults>
</compile_context>

<pallas_src>
import math

import jax
import jax.numpy as jnp
from jax.experimental import pallas as pl
from jax.experimental.pallas import tpu as pltpu

# Small, self-consistent shapes: embed_dim = num_heads * head_dim.
B, S, E = 2, 8, 32          # batch, sequence, embed_dim
H, D = 4, 8                 # num_heads, head_dim  (E == H * D)
assert E == H * D

_INV_SQRT2 = 1.0 / math.sqrt(2.0)


# ------------------------------ kernel helpers ------------------------------ #

def _gelu_exact(y):
    # exact erf GELU -> matches torch nn.GELU() default (kept: numerics-sensitive).
    return 0.5 * y * (1.0 + jax.lax.erf(y * _INV_SQRT2))


def _mhpa_into(x2d, prec_ref, dst_ref, qij_ref=None):
    """Multi-head precision self-attention (q = k = v = x2d).

    x2d:      (B*S, E) activations, E = H*D on the lane axis.
    prec_ref: SMEM (H,) per-head precision already scaled by t_v / sqrt(D).
    dst_ref:  (B*S, E) VMEM ref; head h's output is written to lanes
              [h*D, (h+1)*D)  ->  output is already in (B, S, H*D) layout.
    qij_ref:  optional (B, S, H*S) VMEM ref; head h's softmax written to lanes
              [h*S, (h+1)*S)  (lane-dense, un-flattened in the wrapper).
    """
    # TODO(synk): heads could be fused into one wider MXU op; at S=D=8 the
    # per-head (16x8x8) einsums are pure overhead either way, so kept simple.
    for h in range(H):
        v3 = x2d[:, h * D:(h + 1) * D].reshape(B, S, D)       # (B, S, D)

        # precision-scaled logits; einsum avoids an explicit k transpose.
        s = jnp.einsum("bqd,bkd->bqk", v3, v3,
                       preferred_element_type=jnp.float32)    # (B, S, S)
        s = s * prec_ref[h]

        m = jnp.max(s, axis=-1, keepdims=True)
        e = jnp.exp(s - m)
        denom = jnp.sum(e, axis=-1, keepdims=True)
        p = e * pl.reciprocal(denom, approx=True)             # softmax -> Q_ij (EUP rcp)

        o = jnp.einsum("bqk,bkd->bqd", p, v3,
                       preferred_element_type=jnp.float32)    # (B, S, D)

        # direct lane-slice writes: no list / concat / stack relayouts.
        dst_ref[:, h * D:(h + 1) * D] = o.reshape(B * S, D)
        if qij_ref is not None:
            qij_ref[:, :, h * S:(h + 1) * S] = p


# ------------------------------ fused kernel -------------------------------- #

def _precision_net_kernel(x_ref, w1t_ref, b1_ref, w2t_ref, b2_ref,
                          wot_ref, bo_ref, prec1_ref, prec2_ref,
                          est_ref, out_ref, qij_ref, x5_ref,
                          x3_scratch):
    x = x_ref[...]                                            # (B*S, E)

    # fc1 + GELU residual:  x2 = GELU(x W1^T + b1) + (x W1^T + b1)
    y1 = jnp.dot(x, w1t_ref[...], preferred_element_type=jnp.float32) + b1_ref[...]
    x2 = _gelu_exact(y1) + y1

    # a1 attention block: only its 'out' (x3) is consumed downstream, so skip
    # Q_ij / X_ij_hat / the output projection entirely (they are discarded).
    _mhpa_into(x2, prec1_ref, x3_scratch)
    x3 = x3_scratch[...]

    # fc2 + GELU residual
    y2 = jnp.dot(x3, w2t_ref[...], preferred_element_type=jnp.float32) + b2_ref[...]
    x5 = _gelu_exact(y2) + y2
    x5_ref[...] = x5                                          # needed for X_ij_hat in wrapper

    # a2 attention block: out + Q_ij written lane-dense straight into refs.
    _mhpa_into(x5, prec2_ref, out_ref, qij_ref)

    out2d = out_ref[...]
    est_ref[...] = (jnp.dot(out2d, wot_ref[...],
                            preferred_element_type=jnp.float32)
                    + bo_ref[...]).astype(est_ref.dtype)


# --------------------------------- wrapper ----------------------------------- #

_VMEM_SPEC = pl.BlockSpec(memory_space=pltpu.MemorySpace.VMEM)
_SMEM_SPEC = pl.BlockSpec(memory_space=pltpu.MemorySpace.SMEM)


@jax.jit
def precision_net_forward(params, inputs, t_v):
    # inputs: [B, S, E, 1]  (matches inputs.squeeze(-1) / unsqueeze(-1) pattern)
    x2d = inputs[..., 0].reshape(B * S, E)

    lam1 = jax.nn.softplus(params["a1"]["lambda_h"])          # (H,)
    lam2 = jax.nn.softplus(params["a2"]["lambda_h"])          # (H,)
    inv_sqrt_d = jnp.float32(1.0 / math.sqrt(D))
    prec1 = (lam1 * t_v * inv_sqrt_d).astype(jnp.float32)     # SMEM scalars
    prec2 = (lam2 * t_v * inv_sqrt_d).astype(jnp.float32)

    est2d, out2d, qij_flat, x5_2d = pl.pallas_call(
        _precision_net_kernel,
        out_shape=(
            jax.ShapeDtypeStruct((B * S, E), jnp.float32),        # est
            jax.ShapeDtypeStruct((B * S, E), jnp.float32),        # out (lane-dense heads)
            jax.ShapeDtypeStruct((B, S, H * S), jnp.float32),     # Q_ij (lane-dense heads)
            jax.ShapeDtypeStruct((B * S, E), jnp.float32),        # x5 (for X_ij_hat)
        ),
        in_specs=[_VMEM_SPEC, _VMEM_SPEC, _VMEM_SPEC, _VMEM_SPEC, _VMEM_SPEC,
                  _VMEM_SPEC, _VMEM_SPEC, _SMEM_SPEC, _SMEM_SPEC],
        out_specs=(_VMEM_SPEC, _VMEM_SPEC, _VMEM_SPEC, _VMEM_SPEC),
        scratch_shapes=[pltpu.VMEM((B * S, E), jnp.float32)],     # x3 (a1 output)
    )(
        x2d,
        params["fc1_wt"], params["fc1_b"],
        params["fc2_wt"], params["fc2_b"],
        params["a2"]["w_o_t"], params["a2"]["b_o"],
        prec1, prec2,
    )

    est = est2d.reshape(B, S, E)[..., None]
    out = out2d.reshape(B, S, E)[..., None]

    # Un-flatten lane-dense Q_ij: (B, S, H*S) -> (B, H, S, S).
    Q_ij = jnp.transpose(qij_flat.reshape(B, S, H, S), (0, 2, 1, 3))

    # X_ij_hat[b,h,i,j,d] = Q_ij[b,h,i,j] * v[b,h,j,d], computed in the jitted
    # wrapper (fuses with the reshape/transpose; removes the biggest kernel store).
    v = jnp.transpose(x5_2d.reshape(B, S, H, D), (0, 2, 1, 3))    # (B, H, S, D)
    X_ij_hat_all = Q_ij[..., None] * v[:, :, None, :, :]          # (B, H, S, S, D)

    # TODO(synk): the reference unpacks 4 values from a1 but 5 from a2 with the
    # same block class; x3 is taken as the pre-projection attention output, and
    # softplus(lambda_h) is returned as the fifth value -- verify vs. real block.
    return est, out, Q_ij, X_ij_hat_all, lam2


# ------------------------------ params + main -------------------------------- #

def init_params(key):
    ks = jax.random.split(key, 4)
    std = math.sqrt(2.0 / (E + E))                            # xavier_normal_

    def xavier_t(k):
        # Stored already transposed (in, out) so the kernel does x @ W^T with
        # no per-call .T in the jitted graph (xavier_normal is symmetric for
        # square matrices, so the distribution is unchanged).
        return std * jax.random.normal(k, (E, E), jnp.float32)

    zeros_row = jnp.zeros((1, E), jnp.float32)                # pre-reshaped bias
    return {
        "fc1_wt": xavier_t(ks[0]), "fc1_b": zeros_row,
        "fc2_wt": xavier_t(ks[1]), "fc2_b": zeros_row,
        # a1's w_o/b_o exist (module owns them) but are unused in forward:
        # the PyTorch forward discards a1's est.
        "a1": {"lambda_h": jnp.ones((H,), jnp.float32),
               "w_o_t": xavier_t(ks[2]), "b_o": zeros_row},
        "a2": {"lambda_h": jnp.ones((H,), jnp.float32),
               "w_o_t": xavier_t(ks[3]), "b_o": zeros_row},
    }


if __name__ == "__main__":
    key = jax.random.PRNGKey(0)
    k_in, k_p = jax.random.split(key)
    inputs = jax.random.normal(k_in, (B, S, E, 1), jnp.float32)
    t_v = jnp.float32(1.0)
    params = init_params(k_p)

    outs = precision_net_forward(params, inputs, t_v)
    jax.block_until_ready(outs)

    est, out, Q_ij, X_ij_hat_all, lambda_h = outs
    assert est.shape == (B, S, E, 1)
    assert out.shape == (B, S, E, 1)
    assert Q_ij.shape == (B, H, S, S)
    assert X_ij_hat_all.shape == (B, H, S, S, D)
    assert lambda_h.shape == (H,)
    print("KERNEL_OK")
</pallas_src>

<mosaic_0001>
module attributes {stable_mosaic.version = 11 : i64} {
  func.func @_precision_net_kernel(%arg0: memref<16x32xf32, #tpu.memory_space<vmem>>, %arg1: memref<32x32xf32, #tpu.memory_space<vmem>>, %arg2: memref<1x32xf32, #tpu.memory_space<vmem>>, %arg3: memref<32x32xf32, #tpu.memory_space<vmem>>, %arg4: memref<1x32xf32, #tpu.memory_space<vmem>>, %arg5: memref<32x32xf32, #tpu.memory_space<vmem>>, %arg6: memref<1x32xf32, #tpu.memory_space<vmem>>, %arg7: memref<4xf32, #tpu.memory_space<smem>>, %arg8: memref<4xf32, #tpu.memory_space<smem>>, %arg9: memref<16x32xf32, #tpu.memory_space<vmem>>, %arg10: memref<16x32xf32, #tpu.memory_space<vmem>>, %arg11: memref<2x8x32xf32, #tpu.memory_space<vmem>>, %arg12: memref<16x32xf32, #tpu.memory_space<vmem>>, %arg13: memref<16x32xf32, #tpu.memory_space<vmem>>) attributes {dimension_semantics = [], scalar_prefetch = 0 : i64, scratch_operands = 1 : i64, tpu.core_type = #tpu.core_type<tc>} {
    %c0 = arith.constant 0 : index
    %c0_0 = arith.constant 0 : index
    %0 = vector.load %arg0[%c0, %c0_0] : memref<16x32xf32, #tpu.memory_space<vmem>>, vector<16x32xf32>
    %c0_1 = arith.constant 0 : index
    %c0_2 = arith.constant 0 : index
    %1 = vector.load %arg1[%c0_1, %c0_2] : memref<32x32xf32, #tpu.memory_space<vmem>>, vector<32x32xf32>
    %cst = arith.constant dense<0.000000e+00> : vector<16x32xf32>
    %2 = tpu.matmul %0, %1, %cst {dimension_numbers = #tpu.dot_dimension_numbers<[1], [0], [0], [1], [0, 0, 1, 1], [], []>} : vector<16x32xf32>, vector<32x32xf32>, vector<16x32xf32> -> vector<16x32xf32>
    %c0_3 = arith.constant 0 : index
    %c0_4 = arith.constant 0 : index
    %3 = vector.load %arg2[%c0_3, %c0_4] : memref<1x32xf32, #tpu.memory_space<vmem>>, vector<1x32xf32>
    %4 = vector.broadcast %3 : vector<1x32xf32> to vector<16x32xf32>
    %5 = arith.addf %2, %4 : vector<16x32xf32>
    %cst_5 = arith.constant 5.000000e-01 : f32
    %6 = vector.broadcast %cst_5 : f32 to vector<16x32xf32>
    %7 = arith.mulf %6, %5 : vector<16x32xf32>
    %cst_6 = arith.constant 0.707106769 : f32
    %8 = vector.broadcast %cst_6 : f32 to vector<16x32xf32>
    %9 = arith.mulf %5, %8 : vector<16x32xf32>
    %10 = math.erf %9 : vector<16x32xf32>
    %cst_7 = arith.constant 1.000000e+00 : f32
    %11 = vector.broadcast %cst_7 : f32 to vector<16x32xf32>
    %12 = arith.addf %11, %10 : vector<16x32xf32>
    %13 = arith.mulf %7, %12 : vector<16x32xf32>
    %14 = arith.addf %13, %5 : vector<16x32xf32>
    %15 = vector.extract_strided_slice %14 {offsets = [0, 0], sizes = [16, 8], strides = [1, 1]} : vector<16x32xf32> to vector<16x8xf32>
    %16 = vector.shape_cast %15 : vector<16x8xf32> to vector<2x8x8xf32>
    "tpu.trace_start"() <{level = 10 : i32, message = "bqd,bkd->bqk"}> : () -> ()
    %cst_8 = arith.constant dense<0.000000e+00> : vector<2x8x8xf32>
    %17 = tpu.matmul %16, %16, %cst_8 {dimension_numbers = #tpu.dot_dimension_numbers<[2], [2], [1], [1], [0, 0, 0, 1, 1, 1], [0], [0]>} : vector<2x8x8xf32>, vector<2x8x8xf32>, vector<2x8x8xf32> -> vector<2x8x8xf32>
    "tpu.trace_stop"() : () -> ()
    %c0_9 = arith.constant 0 : index
    %18 = memref.load %arg7[%c0_9] : memref<4xf32, #tpu.memory_space<smem>>
    %19 = vector.broadcast %18 : f32 to vector<2x8x8xf32>
    %20 = arith.mulf %17, %19 : vector<2x8x8xf32>
    %cst_10 = arith.constant dense<0xFF800000> : vector<2x8xf32>
    %21 = vector.multi_reduction <maximumf>, %20, %cst_10 [2] : vector<2x8x8xf32> to vector<2x8xf32>
    %22 = vector.shape_cast %21 : vector<2x8xf32> to vector<2x8x1xf32>
    %23 = vector.broadcast %22 : vector<2x8x1xf32> to vector<2x8x8xf32>
    %24 = arith.subf %20, %23 : vector<2x8x8xf32>
    %25 = math.exp %24 : vector<2x8x8xf32>
    %cst_11 = arith.constant dense<0.000000e+00> : vector<2x8xf32>
    %26 = vector.multi_reduction <add>, %25, %cst_11 [2] : vector<2x8x8xf32> to vector<2x8xf32>
    %27 = vector.shape_cast %26 : vector<2x8xf32> to vector<2x8x1xf32>
    %28 = tpu.reciprocal %27 {approx = true} : vector<2x8x1xf32> -> vector<2x8x1xf32>
    %29 = vector.broadcast %28 : vector<2x8x1xf32> to vector<2x8x8xf32>
    %30 = arith.mulf %25, %29 : vector<2x8x8xf32>
    "tpu.trace_start"() <{level = 10 : i32, message = "bqk,bkd->bqd"}> : () -> ()
    %cst_12 = arith.constant dense<0.000000e+00> : vector<2x8x8xf32>
    %31 = tpu.matmul %30, %16, %cst_12 {dimension_numbers = #tpu.dot_dimension_numbers<[2], [1], [1], [2], [0, 0, 0, 1, 1, 2], [0], [0]>} : vector<2x8x8xf32>, vector<2x8x8xf32>, vector<2x8x8xf32> -> vector<2x8x8xf32>
    "tpu.trace_stop"() : () -> ()
    %32 = vector.shape_cast %31 : vector<2x8x8xf32> to vector<16x8xf32>
    %c0_13 = arith.constant 0 : index
    %c0_14 = arith.constant 0 : index
    %33 = vector.load %arg13[%c0_13, %c0_14] : memref<16x32xf32, #tpu.memory_space<vmem>>, vector<16x8xf32>
    tpu.vector_store %arg13[%c0_13, %c0_14], %32 {strides = array<i32>} : memref<16x32xf32, #tpu.memory_space<vmem>>, vector<16x8xf32>,
    %34 = vector.extract_strided_slice %14 {offsets = [0, 8], sizes = [16, 8], strides = [1, 1]} : vector<16x32xf32> to vector<16x8xf32>
    %35 = vector.shape_cast %34 : vector<16x8xf32> to vector<2x8x8xf32>
    "tpu.trace_start"() <{level = 10 : i32, message = "bqd,bkd->bqk"}> : () -> ()
    %cst_15 = arith.constant dense<0.000000e+00> : vector<2x8x8xf32>
    %36 = tpu.matmul %35, %35, %cst_15 {dimension_numbers = #tpu.dot_dimension_numbers<[2], [2], [1], [1], [0, 0, 0, 1, 1, 1], [0], [0]>} : vector<2x8x8xf32>, vector<2x8x8xf32>, vector<2x8x8xf32> -> vector<2x8x8xf32>
    "tpu.trace_stop"() : () -> ()
    %c1 = arith.constant 1 : index
    %37 = memref.load %arg7[%c1] : memref<4xf32, #tpu.memory_space<smem>>
    %38 = vector.broadcast %37 : f32 to vector<2x8x8xf32>
    %39 = arith.mulf %36, %38 : vector<2x8x8xf32>
    %cst_16 = arith.constant dense<0xFF800000> : vector<2x8xf32>
    %40 = vector.multi_reduction <maximumf>, %39, %cst_16 [2] : vector<2x8x8xf32> to vector<2x8xf32>
    %41 = vector.shape_cast %40 : vector<2x8xf32> to vector<2x8x1xf32>
    %42 = vector.broadcast %41 : vector<2x8x1xf32> to vector<2x8x8xf32>
    %43 = arith.subf %39, %42 : vector<2x8x8xf32>
    %44 = math.exp %43 : vector<2x8x8xf32>
    %cst_17 = arith.constant dense<0.000000e+00> : vector<2x8xf32>
    %45 = vector.multi_reduction <add>, %44, %cst_17 [2] : vector<2x8x8xf32> to vector<2x8xf32>
    %46 = vector.shape_cast %45 : vector<2x8xf32> to vector<2x8x1xf32>
    %47 = tpu.reciprocal %46 {approx = true} : vector<2x8x1xf32> -> vector<2x8x1xf32>
    %48 = vector.broadcast %47 : vector<2x8x1xf32> to vector<2x8x8xf32>
    %49 = arith.mulf %44, %48 : vector<2x8x8xf32>
    "tpu.trace_start"() <{level = 10 : i32, message = "bqk,bkd->bqd"}> : () -> ()
    %cst_18 = arith.constant dense<0.000000e+00> : vector<2x8x8xf32>
    %50 = tpu.matmul %49, %35, %cst_18 {dimension_numbers = #tpu.dot_dimension_numbers<[2], [1], [1], [2], [0, 0, 0, 1, 1, 2], [0], [0]>} : vector<2x8x8xf32>, vector<2x8x8xf32>, vector<2x8x8xf32> -> vector<2x8x8xf32>
    "tpu.trace_stop"() : () -> ()
    %51 = vector.shape_cast %50 : vector<2x8x8xf32> to vector<16x8xf32>
    %c0_19 = arith.constant 0 : index
    %c8 = arith.constant 8 : index
    %52 = vector.load %arg13[%c0_19, %c8] : memref<16x32xf32, #tpu.memory_space<vmem>>, vector<16x8xf32>
    tpu.vector_store %arg13[%c0_19, %c8], %51 {strides = array<i32>} : memref<16x32xf32, #tpu.memory_space<vmem>>, vector<16x8xf32>,
    %53 = vector.extract_strided_slice %14 {offsets = [0, 16], sizes = [16, 8], strides = [1, 1]} : vector<16x32xf32> to vector<16x8xf32>
    %54 = vector.shape_cast %53 : vector<16x8xf32> to vector<2x8x8xf32>
    "tpu.trace_start"() <{level = 10 : i32, message = "bqd,bkd->bqk"}> : () -> ()
    %cst_20 = arith.constant dense<0.000000e+00> : vector<2x8x8xf32>
    %55 = tpu.matmul %54, %54, %cst_20 {dimension_numbers = #tpu.dot_dimension_numbers<[2], [2], [1], [1], [0, 0, 0, 1, 1, 1], [0], [0]>} : vector<2x8x8xf32>, vector<2x8x8xf32>, vector<2x8x8xf32> -> vector<2x8x8xf32>
    "tpu.trace_stop"() : () -> ()
    %c2 = arith.constant 2 : index
    %56 = memref.load %arg7[%c2] : memref<4xf32, #tpu.memory_space<smem>>
    %57 = vector.broadcast %56 : f32 to vector<2x8x8xf32>
    %58 = arith.mulf %55, %57 : vector<2x8x8xf32>
    %cst_21 = arith.constant dense<0xFF800000> : vector<2x8xf32>
    %59 = vector.multi_reduction <maximumf>, %58, %cst_21 [2] : vector<2x8x8xf32> to vector<2x8xf32>
    %60 = vector.shape_cast %59 : vector<2x8xf32> to vector<2x8x1xf32>
    %61 = vector.broadcast %60 : vector<2x8x1xf32> to vector<2x8x8xf32>
    %62 = arith.subf %58, %61 : vector<2x8x8xf32>
    %63 = math.exp %62 : vector<2x8x8xf32>
    %cst_22 = arith.constant dense<0.000000e+00> : vector<2x8xf32>
    %64 = vector.multi_reduction <add>, %63, %cst_22 [2] : vector<2x8x8xf32> to vector<2x8xf32>
    %65 = vector.shape_cast %64 : vector<2x8xf32> to vector<2x8x1xf32>
    %66 = tpu.reciprocal %65 {approx = true} : vector<2x8x1xf32> -> vector<2x8x1xf32>
    %67 = vector.broadcast %66 : vector<2x8x1xf32> to vector<2x8x8xf32>
    %68 = arith.mulf %63, %67 : vector<2x8x8xf32>
    "tpu.trace_start"() <{level = 10 : i32, message = "bqk,bkd->bqd"}> : () -> ()
    %cst_23 = arith.constant dense<0.000000e+00> : vector<2x8x8xf32>
    %69 = tpu.matmul %68, %54, %cst_23 {dimension_numbers = #tpu.dot_dimension_numbers<[2], [1], [1], [2], [0, 0, 0, 1, 1, 2], [0], [0]>} : vector<2x8x8xf32>, vector<2x8x8xf32>, vector<2x8x8xf32> -> vector<2x8x8xf32>
    "tpu.trace_stop"() : () -> ()
    %70 = vector.shape_cast %69 : vector<2x8x8xf32> to vector<16x8xf32>
    %c0_24 = arith.constant 0 : index
    %c16 = arith.constant 16 : index
    %71 = vector.load %arg13[%c0_24, %c16] : memref<16x32xf32, #tpu.memory_space<vmem>>, vector<16x8xf32>
    tpu.vector_store %arg13[%c0_24, %c16], %70 {strides = array<i32>} : memref<16x32xf32, #tpu.memory_space<vmem>>, vector<16x8xf32>,
    %72 = vector.extract_strided_slice %14 {offsets = [0, 24], sizes = [16, 8], strides = [1, 1]} : vector<16x32xf32> to vector<16x8xf32>
    %73 = vector.shape_cast %72 : vector<16x8xf32> to vector<2x8x8xf32>
    "tpu.trace_start"() <{level = 10 : i32, message = "bqd,bkd->bqk"}> : () -> ()
    %cst_25 = arith.constant dense<0.000000e+00> : vector<2x8x8xf32>
    %74 = tpu.matmul %73, %73, %cst_25 {dimension_numbers = #tpu.dot_dimension_numbers<[2], [2], [1], [1], [0, 0, 0, 1, 1, 1], [0], [0]>} : vector<2x8x8xf32>, vector<2x8x8xf32>, vector<2x8x8xf32> -> vector<2x8x8xf32>
    "tpu.trace_stop"() : () -> ()
    %c3 = arith.constant 3 : index
    %75 = memref.load %arg7[%c3] : memref<4xf32, #tpu.memory_space<smem>>
    %76 = vector.broadcast %75 : f32 to vector<2x8x8xf32>
    %77 = arith.mulf %74, %76 : vector<2x8x8xf32>
    %cst_26 = arith.constant dense<0xFF800000> : vector<2x8xf32>
    %78 = vector.multi_reduction <maximumf>, %77, %cst_26 [2] : vector<2x8x8xf32> to vector<2x8xf32>
    %79 = vector.shape_cast %78 : vector<2x8xf32> to vector<2x8x1xf32>
    %80 = vector.broadcast %79 : vector<2x8x1xf32> to vector<2x8x8xf32>
    %81 = arith.subf %77, %80 : vector<2x8x8xf32>
    %82 = math.exp %81 : vector<2x8x8xf32>
    %cst_27 = arith.constant dense<0.000000e+00> : vector<2x8xf32>
    %83 = vector.multi_reduction <add>, %82, %cst_27 [2] : vector<2x8x8xf32> to vector<2x8xf32>
    %84 = vector.shape_cast %83 : vector<2x8xf32> to vector<2x8x1xf32>
    %85 = tpu.reciprocal %84 {approx = true} : vector<2x8x1xf32> -> vector<2x8x1xf32>
    %86 = vector.broadcast %85 : vector<2x8x1xf32> to vector<2x8x8xf32>
    %87 = arith.mulf %82, %86 : vector<2x8x8xf32>
    "tpu.trace_start"() <{level = 10 : i32, message = "bqk,bkd->bqd"}> : () -> ()
    %cst_28 = arith.constant dense<0.000000e+00> : vector<2x8x8xf32>
    %88 = tpu.matmul %87, %73, %cst_28 {dimension_numbers = #tpu.dot_dimension_numbers<[2], [1], [1], [2], [0, 0, 0, 1, 1, 2], [0], [0]>} : vector<2x8x8xf32>, vector<2x8x8xf32>, vector<2x8x8xf32> -> vector<2x8x8xf32>
    "tpu.trace_stop"() : () -> ()
    %89 = vector.shape_cast %88 : vector<2x8x8xf32> to vector<16x8xf32>
    %c0_29 = arith.constant 0 : index
    %c24 = arith.constant 24 : index
    %90 = vector.load %arg13[%c0_29, %c24] : memref<16x32xf32, #tpu.memory_space<vmem>>, vector<16x8xf32>
    tpu.vector_store %arg13[%c0_29, %c24], %89 {strides = array<i32>} : memref<16x32xf32, #tpu.memory_space<vmem>>, vector<16x8xf32>,
    %c0_30 = arith.constant 0 : index
    %c0_31 = arith.constant 0 : index
    %91 = vector.load %arg13[%c0_30, %c0_31] : memref<16x32xf32, #tpu.memory_space<vmem>>, vector<16x32xf32>
    %c0_32 = arith.constant 0 : index
    %c0_33 = arith.constant 0 : index
    %92 = vector.load %arg3[%c0_32, %c0_33] : memref<32x32xf32, #tpu.memory_space<vmem>>, vector<32x32xf32>
    %cst_34 = arith.constant dense<0.000000e+00> : vector<16x32xf32>
    %93 = tpu.matmul %91, %92, %cst_34 {dimension_numbers = #tpu.dot_dimension_numbers<[1], [0], [0], [1], [0, 0, 1, 1], [], []>} : vector<16x32xf32>, vector<32x32xf32>, vector<16x32xf32> -> vector<16x32xf32>
    %c0_35 = arith.constant 0 : index
    %c0_36 = arith.constant 0 : index
    %94 = vector.load %arg4[%c0_35, %c0_36] : memref<1x32xf32, #tpu.memory_space<vmem>>, vector<1x32xf32>
    %95 = vector.broadcast %94 : vector<1x32xf32> to vector<16x32xf32>
    %96 = arith.addf %93, %95 : vector<16x32xf32>
    %cst_37 = arith.constant 5.000000e-01 : f32
    %97 = vector.broadcast %cst_37 : f32 to vector<16x32xf32>
    %98 = arith.mulf %97, %96 : vector<16x32xf32>
    %cst_38 = arith.constant 0.707106769 : f32
    %99 = vector.broadcast %cst_38 : f32 to vector<16x32xf32>
    %100 = arith.mulf %96, %99 : vector<16x32xf32>
    %101 = math.erf %100 : vector<16x32xf32>
    %cst_39 = arith.constant 1.000000e+00 : f32
    %102 = vector.broadcast %cst_39 : f32 to vector<16x32xf32>
    %103 = arith.addf %102, %101 : vector<16x32xf32>
    %104 = arith.mulf %98, %103 : vector<16x32xf32>
    %105 = arith.addf %104, %96 : vector<16x32xf32>
    %c0_40 = arith.constant 0 : index
    %c0_41 = arith.constant 0 : index
    %106 = vector.load %arg12[%c0_40, %c0_41] : memref<16x32xf32, #tpu.memory_space<vmem>>, vector<16x32xf32>
    tpu.vector_store %arg12[%c0_40, %c0_41], %105 {strides = array<i32>} : memref<16x32xf32, #tpu.memory_space<vmem>>, vector<16x32xf32>,
    %107 = vector.extract_strided_slice %105 {offsets = [0, 0], sizes = [16, 8], strides = [1, 1]} : vector<16x32xf32> to vector<16x8xf32>
    %108 = vector.shape_cast %107 : vector<16x8xf32> to vector<2x8x8xf32>
    "tpu.trace_start"() <{level = 10 : i32, message = "bqd,bkd->bqk"}> : () -> ()
    %cst_42 = arith.constant dense<0.000000e+00> : vector<2x8x8xf32>
    %109 = tpu.matmul %108, %108, %cst_42 {dimension_numbers = #tpu.dot_dimension_numbers<[2], [2], [1], [1], [0, 0, 0, 1, 1, 1], [0], [0]>} : vector<2x8x8xf32>, vector<2x8x8xf32>, vector<2x8x8xf32> -> vector<2x8x8xf32>
    "tpu.trace_stop"() : () -> ()
    %c0_43 = arith.constant 0 : index
    %110 = memref.load %arg8[%c0_43] : memref<4xf32, #tpu.memory_space<smem>>
    %111 = vector.broadcast %110 : f32 to vector<2x8x8xf32>
    %112 = arith.mulf %109, %111 : vector<2x8x8xf32>
    %cst_44 = arith.constant dense<0xFF800000> : vector<2x8xf32>
    %113 = vector.multi_reduction <maximumf>, %112, %cst_44 [2] : vector<2x8x8xf32> to vector<2x8xf32>
    %114 = vector.shape_cast %113 : vector<2x8xf32> to vector<2x8x1xf32>
    %115 = vector.broadcast %114 : vector<2x8x1xf32> to vector<2x8x8xf32>
    %116 = arith.subf %112, %115 : vector<2x8x8xf32>
    %117 = math.exp %116 : vector<2x8x8xf32>
    %cst_45 = arith.constant dense<0.000000e+00> : vector<2x8xf32>
    %118 = vector.multi_reduction <add>, %117, %cst_45 [2] : vector<2x8x8xf32> to vector<2x8xf32>
    %119 = vector.shape_cast %118 : vector<2x8xf32> to vector<2x8x1xf32>
    %120 = tpu.reciprocal %119 {approx = true} : vector<2x8x1xf32> -> vector<2x8x1xf32>
    %121 = vector.broadcast %120 : vector<2x8x1xf32> to vector<2x8x8xf32>
    %122 = arith.mulf %117, %121 : vector<2x8x8xf32>
    "tpu.trace_start"() <{level = 10 : i32, message = "bqk,bkd->bqd"}> : () -> ()
    %cst_46 = arith.constant dense<0.000000e+00> : vector<2x8x8xf32>
    %123 = tpu.matmul %122, %108, %cst_46 {dimension_numbers = #tpu.dot_dimension_numbers<[2], [1], [1], [2], [0, 0, 0, 1, 1, 2], [0], [0]>} : vector<2x8x8xf32>, vector<2x8x8xf32>, vector<2x8x8xf32> -> vector<2x8x8xf32>
    "tpu.trace_stop"() : () -> ()
    %124 = vector.shape_cast %123 : vector<2x8x8xf32> to vector<16x8xf32>
    %c0_47 = arith.constant 0 : index
    %c0_48 = arith.constant 0 : index
    %125 = vector.load %arg10[%c0_47, %c0_48] : memref<16x32xf32, #tpu.memory_space<vmem>>, vector<16x8xf32>
    tpu.vector_store %arg10[%c0_47, %c0_48], %124 {strides = array<i32>} : memref<16x32xf32, #tpu.memory_space<vmem>>, vector<16x8xf32>,
    %c0_49 = arith.constant 0 : index
    %c0_50 = arith.constant 0 : index
    %c0_51 = arith.constant 0 : index
    %126 = vector.load %arg11[%c0_49, %c0_50, %c0_51] : memref<2x8x32xf32, #tpu.memory_space<vmem>>, vector<2x8x8xf32>
    tpu.vector_store %arg11[%c0_49, %c0_50, %c0_51], %122 {strides = array<i32>} : memref<2x8x32xf32, #tpu.memory_space<vmem>>, vector<2x8x8xf32>,
    %127 = vector.extract_strided_slice %105 {offsets = [0, 8], sizes = [16, 8], strides = [1, 1]} : vector<16x32xf32> to vector<16x8xf32>
    %128 = vector.shape_cast %127 : vector<16x8xf32> to vector<2x8x8xf32>
    "tpu.trace_start"() <{level = 10 : i32, message = "bqd,bkd->bqk"}> : () -> ()
    %cst_52 = arith.constant dense<0.000000e+00> : vector<2x8x8xf32>
    %129 = tpu.matmul %128, %128, %cst_52 {dimension_numbers = #tpu.dot_dimension_numbers<[2], [2], [1], [1], [0, 0, 0, 1, 1, 1], [0], [0]>} : vector<2x8x8xf32>, vector<2x8x8xf32>, vector<2x8x8xf32> -> vector<2x8x8xf32>
    "tpu.trace_stop"() : () -> ()
    %c1_53 = arith.constant 1 : index
    %130 = memref.load %arg8[%c1_53] : memref<4xf32, #tpu.memory_space<smem>>
    %131 = vector.broadcast %130 : f32 to vector<2x8x8xf32>
    %132 = arith.mulf %129, %131 : vector<2x8x8xf32>
    %cst_54 = arith.constant dense<0xFF800000> : vector<2x8xf32>
    %133 = vector.multi_reduction <maximumf>, %132, %cst_54 [2] : vector<2x8x8xf32> to vector<2x8xf32>
    %134 = vector.shape_cast %133 : vector<2x8xf32> to vector<2x8x1xf32>
    %135 = vector.broadcast %134 : vector<2x8x1xf32> to vector<2x8x8xf32>
    %136 = arith.subf %132, %135 : vector<2x8x8xf32>
    %137 = math.exp %136 : vector<2x8x8xf32>
    %cst_55 = arith.constant dense<0.000000e+00> : vector<2x8xf32>
    %138 = vector.multi_reduction <add>, %137, %cst_55 [2] : vector<2x8x8xf32> to vector<2x8xf32>
    %139 = vector.shape_cast %138 : vector<2x8xf32> to vector<2x8x1xf32>
    %140 = tpu.reciprocal %139 {approx = true} : vector<2x8x1xf32> -> vector<2x8x1xf32>
    %141 = vector.broadcast %140 : vector<2x8x1xf32> to vector<2x8x8xf32>
    %142 = arith.mulf %137, %141 : vector<2x8x8xf32>
    "tpu.trace_start"() <{level = 10 : i32, message = "bqk,bkd->bqd"}> : () -> ()
    %cst_56 = arith.constant dense<0.000000e+00> : vector<2x8x8xf32>
    %143 = tpu.matmul %142, %128, %cst_56 {dimension_numbers = #tpu.dot_dimension_numbers<[2], [1], [1], [2], [0, 0, 0, 1, 1, 2], [0], [0]>} : vector<2x8x8xf32>, vector<2x8x8xf32>, vector<2x8x8xf32> -> vector<2x8x8xf32>
    "tpu.trace_stop"() : () -> ()
    %144 = vector.shape_cast %143 : vector<2x8x8xf32> to vector<16x8xf32>
    %c0_57 = arith.constant 0 : index
    %c8_58 = arith.constant 8 : index
    %145 = vector.load %arg10[%c0_57, %c8_58] : memref<16x32xf32, #tpu.memory_space<vmem>>, vector<16x8xf32>
    tpu.vector_store %arg10[%c0_57, %c8_58], %144 {strides = array<i32>} : memref<16x32xf32, #tpu.memory_space<vmem>>, vector<16x8xf32>,
    %c0_59 = arith.constant 0 : index
    %c0_60 = arith.constant 0 : index
    %c8_61 = arith.constant 8 : index
    %146 = vector.load %arg11[%c0_59, %c0_60, %c8_61] : memref<2x8x32xf32, #tpu.memory_space<vmem>>, vector<2x8x8xf32>
    tpu.vector_store %arg11[%c0_59, %c0_60, %c8_61], %142 {strides = array<i32>} : memref<2x8x32xf32, #tpu.memory_space<vmem>>, vector<2x8x8xf32>,
    %147 = vector.extract_strided_slice %105 {offsets = [0, 16], sizes = [16, 8], strides = [1, 1]} : vector<16x32xf32> to vector<16x8xf32>
    %148 = vector.shape_cast %147 : vector<16x8xf32> to vector<2x8x8xf32>
    "tpu.trace_start"() <{level = 10 : i32, message = "bqd,bkd->bqk"}> : () -> ()
    %cst_62 = arith.constant dense<0.000000e+00> : vector<2x8x8xf32>
    %149 = tpu.matmul %148, %148, %cst_62 {dimension_numbers = #tpu.dot_dimension_numbers<[2], [2], [1], [1], [0, 0, 0, 1, 1, 1], [0], [0]>} : vector<2x8x8xf32>, vector<2x8x8xf32>, vector<2x8x8xf32> -> vector<2x8x8xf32>
    "tpu.trace_stop"() : () -> ()
    %c2_63 = arith.constant 2 : index
    %150 = memref.load %arg8[%c2_63] : memref<4xf32, #tpu.memory_space<smem>>
    %151 = vector.broadcast %150 : f32 to vector<2x8x8xf32>
    %152 = arith.mulf %149, %151 : vector<2x8x8xf32>
    %cst_64 = arith.constant dense<0xFF800000> : vector<2x8xf32>
    %153 = vector.multi_reduction <maximumf>, %152, %cst_64 [2] : vector<2x8x8xf32> to vector<2x8xf32>
    %154 = vector.shape_cast %153 : vector<2x8xf32> to vector<2x8x1xf32>
    %155 = vector.broadcast %154 : vector<2x8x1xf32> to vector<2x8x8xf32>
    %156 = arith.subf %152, %155 : vector<2x8x8xf32>
    %157 = math.exp %156 : vector<2x8x8xf32>
    %cst_65 = arith.constant dense<0.000000e+00> : vector<2x8xf32>
    %158 = vector.multi_reduction <add>, %157, %cst_65 [2] : vector<2x8x8xf32> to vector<2x8xf32>
    %159 = vector.shape_cast %158 : vector<2x8xf32> to vector<2x8x1xf32>
    %160 = tpu.reciprocal %159 {approx = true} : vector<2x8x1xf32> -> vector<2x8x1xf32>
    %161 = vector.broadcast %160 : vector<2x8x1xf32> to vector<2x8x8xf32>
    %162 = arith.mulf %157, %161 : vector<2x8x8xf32>
    "tpu.trace_start"() <{level = 10 : i32, message = "bqk,bkd->bqd"}> : () -> ()
    %cst_66 = arith.constant dense<0.000000e+00> : vector<2x8x8xf32>
    %163 = tpu.matmul %162, %148, %cst_66 {dimension_numbers = #tpu.dot_dimension_numbers<[2], [1], [1], [2], [0, 0, 0, 1, 1, 2], [0], [0]>} : vector<2x8x8xf32>, vector<2x8x8xf32>, vector<2x8x8xf32> -> vector<2x8x8xf32>
    "tpu.trace_stop"() : () -> ()
    %164 = vector.shape_cast %163 : vector<2x8x8xf32> to vector<16x8xf32>
    %c0_67 = arith.constant 0 : index
    %c16_68 = arith.constant 16 : index
    %165 = vector.load %arg10[%c0_67, %c16_68] : memref<16x32xf32, #tpu.memory_space<vmem>>, vector<16x8xf32>
    tpu.vector_store %arg10[%c0_67, %c16_68], %164 {strides = array<i32>} : memref<16x32xf32, #tpu.memory_space<vmem>>, vector<16x8xf32>,
    %c0_69 = arith.constant 0 : index
    %c0_70 = arith.constant 0 : index
    %c16_71 = arith.constant 16 : index
    %166 = vector.load %arg11[%c0_69, %c0_70, %c16_71] : memref<2x8x32xf32, #tpu.memory_space<vmem>>, vector<2x8x8xf32>
    tpu.vector_store %arg11[%c0_69, %c0_70, %c16_71], %162 {strides = array<i32>} : memref<2x8x32xf32, #tpu.memory_space<vmem>>, vector<2x8x8xf32>,
    %167 = vector.extract_strided_slice %105 {offsets = [0, 24], sizes = [16, 8], strides = [1, 1]} : vector<16x32xf32> to vector<16x8xf32>
    %168 = vector.shape_cast %167 : vector<16x8xf32> to vector<2x8x8xf32>
    "tpu.trace_start"() <{level = 10 : i32, message = "bqd,bkd->bqk"}> : () -> ()
    %cst_72 = arith.constant dense<0.000000e+00> : vector<2x8x8xf32>
    %169 = tpu.matmul %168, %168, %cst_72 {dimension_numbers = #tpu.dot_dimension_numbers<[2], [2], [1], [1], [0, 0, 0, 1, 1, 1], [0], [0]>} : vector<2x8x8xf32>, vector<2x8x8xf32>, vector<2x8x8xf32> -> vector<2x8x8xf32>
    "tpu.trace_stop"() : () -> ()
    %c3_73 = arith.constant 3 : index
    %170 = memref.load %arg8[%c3_73] : memref<4xf32, #tpu.memory_space<smem>>
    %171 = vector.broadcast %170 : f32 to vector<2x8x8xf32>
    %172 = arith.mulf %169, %171 : vector<2x8x8xf32>
    %cst_74 = arith.constant dense<0xFF800000> : vector<2x8xf32>
    %173 = vector.multi_reduction <maximumf>, %172, %cst_74 [2] : vector<2x8x8xf32> to vector<2x8xf32>
    %174 = vector.shape_cast %173 : vector<2x8xf32> to vector<2x8x1xf32>
    %175 = vector.broadcast %174 : vector<2x8x1xf32> to vector<2x8x8xf32>
    %176 = arith.subf %172, %175 : vector<2x8x8xf32>
    %177 = math.exp %176 : vector<2x8x8xf32>
    %cst_75 = arith.constant dense<0.000000e+00> : vector<2x8xf32>
    %178 = vector.multi_reduction <add>, %177, %cst_75 [2] : vector<2x8x8xf32> to vector<2x8xf32>
    %179 = vector.shape_cast %178 : vector<2x8xf32> to vector<2x8x1xf32>
    %180 = tpu.reciprocal %179 {approx = true} : vector<2x8x1xf32> -> vector<2x8x1xf32>
    %181 = vector.broadcast %180 : vector<2x8x1xf32> to vector<2x8x8xf32>
    %182 = arith.mulf %177, %181 : vector<2x8x8xf32>
    "tpu.trace_start"() <{level = 10 : i32, message = "bqk,bkd->bqd"}> : () -> ()
    %cst_76 = arith.constant dense<0.000000e+00> : vector<2x8x8xf32>
    %183 = tpu.matmul %182, %168, %cst_76 {dimension_numbers = #tpu.dot_dimension_numbers<[2], [1], [1], [2], [0, 0, 0, 1, 1, 2], [0], [0]>} : vector<2x8x8xf32>, vector<2x8x8xf32>, vector<2x8x8xf32> -> vector<2x8x8xf32>
    "tpu.trace_stop"() : () -> ()
    %184 = vector.shape_cast %183 : vector<2x8x8xf32> to vector<16x8xf32>
    %c0_77 = arith.constant 0 : index
    %c24_78 = arith.constant 24 : index
    %185 = vector.load %arg10[%c0_77, %c24_78] : memref<16x32xf32, #tpu.memory_space<vmem>>, vector<16x8xf32>
    tpu.vector_store %arg10[%c0_77, %c24_78], %184 {strides = array<i32>} : memref<16x32xf32, #tpu.memory_space<vmem>>, vector<16x8xf32>,
    %c0_79 = arith.constant 0 : index
    %c0_80 = arith.constant 0 : index
    %c24_81 = arith.constant 24 : index
    %186 = vector.load %arg11[%c0_79, %c0_80, %c24_81] : memref<2x8x32xf32, #tpu.memory_space<vmem>>, vector<2x8x8xf32>
    tpu.vector_store %arg11[%c0_79, %c0_80, %c24_81], %182 {strides = array<i32>} : memref<2x8x32xf32, #tpu.memory_space<vmem>>, vector<2x8x8xf32>,
    %c0_82 = arith.constant 0 : index
    %c0_83 = arith.constant 0 : index
    %187 = vector.load %arg10[%c0_82, %c0_83] : memref<16x32xf32, #tpu.memory_space<vmem>>, vector<16x32xf32>
    %c0_84 = arith.constant 0 : index
    %c0_85 = arith.constant 0 : index
    %188 = vector.load %arg5[%c0_84, %c0_85] : memref<32x32xf32, #tpu.memory_space<vmem>>, vector<32x32xf32>
    %cst_86 = arith.constant dense<0.000000e+00> : vector<16x32xf32>
    %189 = tpu.matmul %187, %188, %cst_86 {dimension_numbers = #tpu.dot_dimension_numbers<[1], [0], [0], [1], [0, 0, 1, 1], [], []>} : vector<16x32xf32>, vector<32x32xf32>, vector<16x32xf32> -> vector<16x32xf32>
    %c0_87 = arith.constant 0 : index
    %c0_88 = arith.constant 0 : index
    %190 = vector.load %arg6[%c0_87, %c0_88] : memref<1x32xf32, #tpu.memory_space<vmem>>, vector<1x32xf32>
    %191 = vector.broadcast %190 : vector<1x32xf32> to vector<16x32xf32>
    %192 = arith.addf %189, %191 : vector<16x32xf32>
    %c0_89 = arith.constant 0 : index
    %c0_90 = arith.constant 0 : index
    %193 = vector.load %arg9[%c0_89, %c0_90] : memref<16x32xf32, #tpu.memory_space<vmem>>, vector<16x32xf32>
    tpu.vector_store %arg9[%c0_89, %c0_90], %192 {strides = array<i32>} : memref<16x32xf32, #tpu.memory_space<vmem>>, vector<16x32xf32>,
    return
  }
}

</mosaic_0001>

<bundles_post_ra>
// kernel: precision_net_forward.1
= control target key start
LH: loop header
LB: loop body
LE: loop exit
PB: predicated region body
PF: predicated region fallthrough
CT: control target
= control target key end

     0   :  { %18 = vsyncpa [#allocation4], 0  ;;  %s4186_s0 = inlined_call_operand.vmem [shape: f32[16,32], index: 0, kind: input, shape index: {}]   ;;  %s4187_s1 = inlined_call_operand.vmem [shape: f32[32,32], index: 1, kind: input, shape index: {}]   ;;  %s4188_s2 = inlined_call_operand.vmem [shape: f32[1,32], index: 2, kind: input, shape index: {}]   ;;  %s4189_s3 = inlined_call_operand.hbm [shape: f32[32,32], index: 3, kind: input, shape index: {}]   ;;  %s4190_s4 = inlined_call_operand.vmem [shape: f32[1,32], index: 4, kind: input, shape index: {}]   ;;  %s4191_s5 = inlined_call_operand.hbm [shape: f32[32,32], index: 5, kind: input, shape index: {}]   ;;  %s4192_s6 = inlined_call_operand.vmem [shape: f32[1,32], index: 6, kind: input, shape index: {}]   ;;  %s4193_s7 = inlined_call_operand.vmem [shape: f32[4], index: 7, kind: input, shape index: {}]   ;;  %s4194_s8 = inlined_call_operand.vmem [shape: f32[4], index: 8, kind: input, shape index: {}]   ;;  %s4195_s9 = inlined_call_operand.hbm [shape: f32[16,32], index: 9, kind: output, shape index: {0}]   ;;  %s4196_s10 = inlined_call_operand.hbm [shape: f32[16,32], index: 10, kind: output, shape index: {1}]   ;;  %s4197_s11 = inlined_call_operand.vmem [shape: f32[2,8,32], index: 11, kind: output, shape index: {2}]   ;;  %s4198_s12 = inlined_call_operand.vmem [shape: f32[16,32], index: 12, kind: output, shape index: {3}]  }
   0x1   :  { %19 = vsyncpa [#allocation8], 0 }
   0x2   :  { %20 = vsyncpa [#allocation6], 0 }
   0x3   :  { %21 = vsyncpa [#allocation11], 0 }
   0x4   :  { %22 = vsyncpa [#allocation5], 0 }
   0x5   :  { %23 = vsyncpa [#allocation14], 0  ;;  %s3681_s21 = smov [#allocation3]   ;;  %s3557_s25 = scalar_lea.hbm %s4189_s3, 512 }
   0x6   :  { %s35_s22 = sshll.u32 %s3681_s21, 4  ;;  %p3558_p0 = scmp.ne.s32.totalorder %s4189_s3, %s3557_s25  ;;  %s36_s22 = int_to_ptr.vmem [resolvable:$true] %s35_s22 }
   0x7   :  { %p3561_p1 = scmp.lt.u32.totalorder %s3557_s25, %s4189_s3 }
   0x9   :  { %p3563_p2 = pnand %p3561_p1, %p3558_p0 }
   0xb   :  { %3566 = shalt.err (!%p3563_p2)
}
   0xc   :  { %s3567_s30 = scalar_lea.vmem %s36_s22, 512  ;;  %p3572_p4 = scmp.lt.s32.totalorder %s36_s22, %s36_s22 }
   0xd   :  { %p3568_p3 = scmp.ne.s32.totalorder %s36_s22, %s3567_s30  ;;  %p3573_p5 = scmp.lt.s32.totalorder %s3567_s30, %s3567_s30 }
   0xf   :  { %p3574_p6 = por %p3573_p5, %p3572_p4 }
  0x11   :  { %p3575_p7 = pnand %p3574_p6, %p3568_p3 }
  0x13   :  { %3578 = shalt.err (!%p3575_p7)
}
  0x14   :  { %s3682_s13 = smov 128   ;;  %s3683_s14 = smov 8  }
  0x15   :  { %41 = dma.hbm_to_vmem [thread:$0]  %s4189_s3, 512, %s36_s22, [#allocation4], %s3682_s13, %s3682_s13, %s3683_s14  }
  0x16   :  { %s3684_s17 = smov [#allocation7]   ;;  %s64_s21 = sshll.u32 %s4193_s7, 4  ;;  %s65_s21 = int_to_ptr.vmem [resolvable:$true] %s64_s21 }
  0x17   :  { %s49_s18 = sshll.u32 %s3684_s17, 4  ;;  %s3579_s25 = scalar_lea.hbm %s4191_s5, 512  ;;  %s50_s18 = int_to_ptr.vmem [resolvable:$true] %s49_s18 }
  0x18   :  { %p3580_p8 = scmp.ne.s32.totalorder %s4191_s5, %s3579_s25  ;;  %p3583_p9 = scmp.lt.u32.totalorder %s3579_s25, %s4191_s5 }
  0x1a   :  { %p3585_p10 = pnand %p3583_p9, %p3580_p8 }
  0x1c   :  { %3588 = shalt.err (!%p3585_p10)
}
  0x1d   :  { %s3589_s3 = scalar_lea.vmem %s50_s18, 512  ;;  %p3594_p12 = scmp.lt.s32.totalorder %s50_s18, %s50_s18 }
  0x1e   :  { %p3590_p11 = scmp.ne.s32.totalorder %s50_s18, %s3589_s3  ;;  %p3595_p13 = scmp.lt.s32.totalorder %s3589_s3, %s3589_s3 }
  0x20   :  { %p3596_p0 = por %p3595_p13, %p3594_p12 }
  0x22   :  { %p3597_p1 = pnand %p3596_p0, %p3590_p11 }
  0x24   :  { %3600 = shalt.err (!%p3597_p1)
}
  0x25   :  { %55 = dma.hbm_to_vmem [thread:$0]  %s4191_s5, 512, %s50_s18, [#allocation8], %s3682_s13, %s3682_s13, %s3683_s14  }
  0x26   :  { %s74_s16 = sshll.u32 %s4194_s8, 4  ;;  %s3601_s17 = scalar_lea.vmem %s65_s21, 16  ;;  %s75_s16 = int_to_ptr.vmem [resolvable:$true] %s74_s16 }
  0x27   :  { %p3602_p2 = scmp.ne.s32.totalorder %s65_s21, %s3601_s17  ;;  %p3606_p3 = scmp.lt.s32.totalorder %s65_s21, %s65_s21 }
  0x28   :  { %p3607_p4 = scmp.lt.s32.totalorder %s3601_s17, %s3601_s17 }
  0x2a   :  { %p3608_p5 = por %p3607_p4, %p3606_p3 }
  0x2c   :  { %p3609_p6 = pnand %p3608_p5, %p3602_p2 }
  0x2e   :  { %3612 = shalt.err (!%p3609_p6)
}
  0x2f   :  { %s3685_s19 = smov [#allocation9]   ;;  %s3613_s20 = scalar_lea.vmem %s75_s16, 16 }
  0x30   :  { %67 = dma.vmem_to_smem %s65_s21, 16, %s3685_s19, [#allocation6]  }
  0x31   :  { %p3614_p7 = scmp.ne.s32.totalorder %s75_s16, %s3613_s20  ;;  %p3618_p8 = scmp.lt.s32.totalorder %s75_s16, %s75_s16 }
  0x32   :  { %p3619_p9 = scmp.lt.s32.totalorder %s3613_s20, %s3613_s20 }
  0x34   :  { %p3620_p10 = por %p3619_p9, %p3618_p8 }
  0x36   :  { %p3621_p11 = pnand %p3620_p10, %p3614_p7 }
  0x38   :  { %3624 = shalt.err (!%p3621_p11)
}
  0x39   :  { %s3686_s5 = smov [#allocation10]  }
  0x3a   :  { %77 = dma.vmem_to_smem %s75_s16, 16, %s3686_s5, [#allocation11]  }
  0x3b   :  { %3669 = dma.done.wait [#allocation4], 512  }
  0x3c   :  { %3670 = vsyncadd [#allocation4], 4294966784 }
  0x3d   :  { %3671 = dma.done.wait [#allocation8], 512  }
  0x3e   :  { %3672 = vsyncadd [#allocation8], 4294966784 }
  0x3f   :  { %3673 = dma.done.wait [#allocation6], 16  }
  0x40   :  { %3674 = vsyncadd [#allocation6], 4294967280 }
  0x41   :  { %3675 = dma.done.wait [#allocation11], 16  }
  0x42   :  { %3676 = vsyncadd [#allocation11], 4294967280 }
  0x43   :  { %90 = sfence }
  0x44   :  { %v93_v0 = vld [vmem:[%s4187_s1] sm:$0xff]  ;;  %v94_v1 = vld [vmem:[%s4187_s1 + $0x8] sm:$0xff]  ;;  %v95_v2 = vld [vmem:[%s4187_s1 + $0x10] sm:$0xff]  ;;  %vm104_vm0 = vcmask 261120   ;;  %v3687_v8 = vmov 0.0   ;;  %vm3688_vm1 = vmmov 0  }
  0x45   :  { %v3446_v3 = vpack.c.bf16 %v94_v1, %v93_v0  ;;  %v96_v4 = vld [vmem:[%s4187_s1 + $0x18] sm:$0xff]  ;;  %v91_v5 = vld [vmem:[%s4186_s0] sm:$0xff]  ;;  %v92_v7 = vld [vmem:[%s4186_s0 + $0x8] sm:$0xff]  ;;  %3264 = vmatprep.subr.mxu1 %v3687_v8  ;;  %3266 = vmatprep.mubr.msk.f32.mxu1 %vm3688_vm1, %v3687_v8  ;;  %vm198_vm2 = vcmask 64512   ;;  %s345_s0 = sld [smem:[#allocation9]]  ;;  %s3121_s30 = sld [smem:[#allocation9 + $0x1]] }
  0x46   :  { %v3450_v6 = vpack.c.bf16 %v96_v4, %v95_v2  ;;  %3261 = vmatprep.mubr.msk.f32.mxu0 %vm104_vm0, %v91_v5  ;;  %v3108_v9 = vld [vmem:[%s4188_s2] ss:$0 sm:$0xff]  ;;  %s3689_s2 = smov 120   ;;  %s3690_s15 = smov 112   ;;  %vm849_vm3 = vcmask 130112   ;;  %vm1182_vm4 = vcmask 195712  }
  0x47   :  { %3447 = vmatprep.subr.bf16.mxu0 %v3446_v3  ;;  %s3128_s16 = sld [smem:[#allocation9 + $0x2]]  ;;  %s3691_s17 = smov 104   ;;  %vm1515_vm5 = vcmask 261312  }
  0x48   :  { %3449 = vmatpush3.bf16.msra.mxu0 %v3446_v3  ;;  %s3135_s19 = sld [smem:[#allocation9 + $0x3]]  ;;  %s3692_s20 = smov 16  }
  0x49   :  { %3451 = vmatprep.subr.bf16.mxu0 %v3450_v6  ;;  %s3693_s5 = smov 24   ;;  %s3151_s29 = sld [smem:[#allocation10 + $0x1]] }
  0x4a   :  { %s3158_s3 = sld [smem:[#allocation10 + $0x2]]  ;;  %s3165_s7 = sld [smem:[#allocation10 + $0x3]] }
  0x4b   :  { %v346_v26 = vstv %s345_s0  ;;  %v668_v53 = vstv %s3121_s30  ;;  %s3694_s18 = smov [#allocation13]  }
  0x4c   :  { %3453 = vmatpush3.bf16.msra.mxu0 %v3450_v6 }
  0x4d   :  { %3284 = vmatprep.subr.mxu0 %v3687_v8 }
  0x4f   :  { %3262 = vmatmul.mubr.msk.f32.vlgmr.msra.gmra.mrb[0].mxu0 %vm104_vm0, %v92_v7 }
  0x50   :  { %3286 = vmatprep.mubr.msk.f32.mxu0 %vm3688_vm1, %v3687_v8 }
 0x122   :  { %v3263_v10 = vpop.f32.mrb[0].mxu0 }
 0x123   :  { %v183_v11 = vadd.f32 %v3263_v10, %v3108_v9  ;;  %v177_v12 = vpop.f32.mrb[1].mxu0 }
 0x124   :  { %v178_v13 = vadd.f32 %v3108_v9, %v177_v12 }
 0x125   :  { %v189_v14 = vmul.f32 0.70710677, %v183_v11  ;;  %v187_v21 = vmul.f32 0.5, %v183_v11 }
 0x126   :  { %v188_v15 = vmul.f32 0.70710677, %v178_v13  ;;  %v186_v19 = vmul.f32 0.5, %v178_v13 }
 0x127   :  { %3485 = verf.f32 %v189_v14 }
 0x128   :  { %3487 = verf.f32 %v188_v15 }
 0x131   :  { %v3486_v16 = vpop.eup %3485 }
 0x132   :  { %v3488_v17 = vpop.eup %3487  ;;  %v193_v18 = vadd.f32 1.0, %v3486_v16 }
 0x133   :  { %v192_v20 = vadd.f32 1.0, %v3488_v17 }
 0x134   :  { %v195_v23 = vmul.f32 %v193_v18, %v187_v21 }
 0x135   :  { %v194_v22 = vmul.f32 %v192_v20, %v186_v19 }
 0x136   :  { %v3831_v25 = vadd.f32 %v195_v23, %v183_v11  ;;  %v1001_v23 = vstv %s3128_s16 }
 0x137   :  { %v3826_v24 = vadd.f32 %v194_v22, %v178_v13 }
 0x139   :  { %3265 = vmatpush3.xpose.msk.msra.mxu1 %vm198_vm2, %v3826_v24 }
 0x13a   :  { %3269 = vmatprep.subr.mxu1 %v3687_v8 }
 0x13c   :  { %3267 = vmatmul.mubr.msk.f32.vlgmr.msra.gmra.mrb[0].mxu1 %vm198_vm2, %v3826_v24 }
 0x13d   :  { %3270 = vmatpush3.xpose.msk.msra.mxu1 %vm198_vm2, %v3831_v25  ;;  %3271 = vmatprep.mubr.msk.f32.mxu1 %vm3688_vm1, %v3687_v8 }
 0x13e   :  { %3274 = vmatprep.subr.mxu1 %v3687_v8 }
 0x140   :  { %3272 = vmatmul.mubr.msk.f32.vlgmr.msra.gmra.mrb[2].mxu1 %vm198_vm2, %v3831_v25 }
 0x141   :  { %3275 = vmatpush3.msra.mxu1 %v3826_v24  ;;  %3276 = vmatprep.mubr.msk.f32.mxu1 %vm3688_vm1, %v3687_v8 }
 0x142   :  { %3279 = vmatprep.subr.mxu1 %v3687_v8 }
 0x20f   :  { %v268_v27 = vpop.f32.mrb[0].mxu1 }
 0x210   :  { %v347_v28 = vmul.f32 %v346_v26, %v268_v27  ;;  %v3268_v29 = vpop.f32.mrb[1].mxu1 }
 0x212   :  { %v349_v30 = vsel %vm198_vm2, %v347_v28, -inf }
 0x213   :  { %350 = vmax.xlane.f32.xlu0 %v349_v30  ;;  %v341_v31 = vpop.f32.mrb[2].mxu1 }
 0x214   :  { %v348_v32 = vmul.f32 %v346_v26, %v341_v31  ;;  %v3273_v33 = vpop.f32.mrb[3].mxu1 }
 0x216   :  { %v352_v34 = vsel %vm198_vm2, %v348_v32, -inf }
 0x217   :  { %353 = vmax.xlane.f32.xlu0 %v352_v34 }
 0x22d   :  { %519 = vrot.lane.b32.xlu0 %v3826_v24, %s3689_s2 }
 0x2a0   :  { %v351_v35 = vpop.xlane.xlu0 %350 }
 0x2a1   :  { %v355_v36 = vsub.f32 %v347_v28, %v351_v35 }
 0x2a3   :  { %v357_v37 = vmul.f32 1.442695, %v355_v36 }
 0x2a4   :  { %v354_v38 = vpop.xlane.xlu0 %353 }
 0x2a5   :  { %3489 = vpow2.f32 %v357_v37  ;;  %v356_v39 = vsub.f32 %v348_v32, %v354_v38 }
 0x2a7   :  { %v359_v40 = vmul.f32 1.442695, %v356_v39 }
 0x2a8   :  { %v520_v41 = vpop.permute.xlu0 %519 }
 0x2a9   :  { %3491 = vpow2.f32 %v359_v40  ;;  %3285 = vmatpush3.xpose.msk.msra.mxu0 %vm198_vm2, %v520_v41 }
 0x2aa   :  { %3294 = vmatprep.subr.mxu0 %v3687_v8 }
 0x2ac   :  { %3287 = vmatmul.mubr.msk.f32.vlgmr.msra.gmra.mrb[2].mxu0 %vm198_vm2, %v520_v41 }
 0x2ad   :  { %3295 = vmatpush3.msra.mxu0 %v520_v41  ;;  %3296 = vmatprep.mubr.msk.f32.mxu0 %vm3688_vm1, %v3687_v8 }
 0x2ae   :  { %3304 = vmatprep.subr.mxu0 %v3687_v8 }
 0x2af   :  { %v3490_v42 = vpop.eup %3489 }
 0x2b0   :  { %v361_v43 = vsel %vm198_vm2, %v3490_v42, 0.0 }
 0x2b1   :  { %362 = vadd.xlane.f32.xlu1 %v361_v43 }
 0x2b3   :  { %v3492_v44 = vpop.eup %3491 }
 0x2b4   :  { %v364_v45 = vsel %vm198_vm2, %v3492_v44, 0.0 }
 0x2b5   :  { %365 = vadd.xlane.f32.xlu1 %v364_v45 }
 0x2c6   :  { %593 = vrot.lane.b32.xlu1 %v3831_v25, %s3689_s2 }
 0x33e   :  { %v363_v46 = vpop.xlane.xlu1 %362 }
 0x33f   :  { %3493 = vrcp.f32 %v363_v46 }
 0x342   :  { %v366_v47 = vpop.xlane.xlu1 %365 }
 0x343   :  { %3495 = vrcp.f32 %v366_v47 }
 0x346   :  { %v594_v52 = vpop.permute.xlu1 %593 }
 0x349   :  { %v3494_v48 = vpop.eup %3493 }
 0x34a   :  { %v369_v49 = vmul.f32 %v3494_v48, %v3490_v42 }
 0x34c   :  { %3277 = vmatmul.mubr.msk.f32.vlgmr.msra.gmra.mrb[4].mxu1 %vm198_vm2, %v369_v49 }
 0x34d   :  { %v3496_v50 = vpop.eup %3495  ;;  %3280 = vmatpush3.msra.mxu1 %v3831_v25  ;;  %3281 = vmatprep.mubr.msk.f32.mxu1 %vm3688_vm1, %v3687_v8 }
 0x34e   :  { %v370_v51 = vmul.f32 %v3496_v50, %v3492_v44  ;;  %3289 = vmatprep.subr.mxu1 %v3687_v8 }
 0x350   :  { %3282 = vmatmul.mubr.msk.f32.vlgmr.msra.gmra.mrb[6].mxu1 %vm198_vm2, %v370_v51 }
 0x351   :  { %3291 = vmatprep.mubr.msk.f32.mxu1 %vm3688_vm1, %v3687_v8 }
 0x354   :  { %3290 = vmatpush3.xpose.msk.msra.mxu1 %vm198_vm2, %v594_v52 }
 0x355   :  { %3299 = vmatprep.subr.mxu1 %v3687_v8 }
 0x357   :  { %3292 = vmatmul.mubr.msk.f32.vlgmr.msra.gmra.mrb[8].mxu1 %vm198_vm2, %v594_v52 }
 0x358   :  { %3300 = vmatpush3.msra.mxu1 %v594_v52  ;;  %3301 = vmatprep.mubr.msk.f32.mxu1 %vm3688_vm1, %v3687_v8 }
 0x359   :  { %3309 = vmatprep.subr.mxu1 %v3687_v8 }
 0x37f   :  { %v589_v54 = vpop.f32.mrb[2].mxu0 }
 0x380   :  { %v669_v55 = vmul.f32 %v668_v53, %v589_v54  ;;  %v3288_v56 = vpop.f32.mrb[3].mxu0  ;;  %v1334_v54 = vstv %s3135_s19 }
 0x382   :  { %v671_v57 = vsel %vm198_vm2, %v669_v55, -inf }
 0x383   :  { %672 = vmax.xlane.f32.xlu1 %v671_v57 }
 0x410   :  { %v673_v58 = vpop.xlane.xlu1 %672 }
 0x411   :  { %v677_v59 = vsub.f32 %v669_v55, %v673_v58 }
 0x413   :  { %v679_v61 = vmul.f32 1.442695, %v677_v59 }
 0x415   :  { %3497 = vpow2.f32 %v679_v61 }
 0x41f   :  { %v440_v60 = vpop.f32.mrb[4].mxu1  ;;  %v3498_v5 = vpop.eup %3497 }
 0x420   :  { %517 = vst.msk [vmem:[#allocation2] sm:$0xff] %vm198_vm2, %v440_v60  ;;  %v3278_v62 = vpop.f32.mrb[5].mxu1  ;;  %v683_v6 = vsel %vm198_vm2, %v3498_v5, 0.0 }
 0x423   :  { %v513_v63 = vpop.f32.mrb[6].mxu1 }
 0x424   :  { %518 = vst.msk [vmem:[#allocation2 + $0x8] sm:$0xff] %vm198_vm2, %v513_v63  ;;  %v3283_v0 = vpop.f32.mrb[7].mxu1 }
 0x42a   :  { %v663_v1 = vpop.f32.mrb[8].mxu1 }
 0x42b   :  { %v670_v2 = vmul.f32 %v668_v53, %v663_v1  ;;  %v3293_v3 = vpop.f32.mrb[9].mxu1 }
 0x42d   :  { %v674_v4 = vsel %vm198_vm2, %v670_v2, -inf }
 0x42e   :  { %675 = vmax.xlane.f32.xlu0 %v674_v4 }
 0x432   :  { %684 = vadd.xlane.f32.xlu0 %v683_v6 }
 0x448   :  { %852 = vrot.lane.b32.xlu0 %v3826_v24, %s3690_s15 }
 0x4bb   :  { %v676_v7 = vpop.xlane.xlu0 %675 }
 0x4bc   :  { %v678_v9 = vsub.f32 %v670_v2, %v676_v7 }
 0x4be   :  { %v681_v10 = vmul.f32 1.442695, %v678_v9 }
 0x4bf   :  { %v685_v11 = vpop.xlane.xlu0 %684 }
 0x4c0   :  { %3499 = vpow2.f32 %v681_v10 }
 0x4c1   :  { %3501 = vrcp.f32 %v685_v11 }
 0x4c3   :  { %v853_v16 = vpop.permute.xlu0 %852 }
 0x4ca   :  { %v3500_v12 = vpop.eup %3499 }
 0x4cb   :  { %v3502_v13 = vpop.eup %3501  ;;  %v686_v14 = vsel %vm198_vm2, %v3500_v12, 0.0 }
 0x4cc   :  { %v691_v15 = vmul.f32 %v3502_v13, %v3498_v5  ;;  %687 = vadd.xlane.f32.xlu1 %v686_v14 }
 0x4ce   :  { %3297 = vmatmul.mubr.msk.f32.vlgmr.msra.gmra.mrb[4].mxu0 %vm198_vm2, %v691_v15 }
 0x4cf   :  { %3305 = vmatpush3.xpose.msk.msra.mxu0 %vm198_vm2, %v853_v16  ;;  %3306 = vmatprep.mubr.msk.f32.mxu0 %vm3688_vm1, %v3687_v8 }
 0x4d0   :  { %3314 = vmatprep.subr.mxu0 %v3687_v8 }
 0x4d2   :  { %3307 = vmatmul.mubr.msk.f32.vlgmr.msra.gmra.mrb[6].mxu0 %vm198_vm2, %v853_v16 }
 0x4d3   :  { %3315 = vmatpush3.msra.mxu0 %v853_v16  ;;  %3316 = vmatprep.mubr.msk.f32.mxu0 %vm3688_vm1, %v3687_v8 }
 0x4d4   :  { %3324 = vmatprep.subr.mxu0 %v3687_v8 }
 0x4dd   :  { %926 = vrot.lane.b32.xlu1 %v3831_v25, %s3690_s15 }
 0x559   :  { %v688_v17 = vpop.xlane.xlu1 %687 }
 0x55a   :  { %3503 = vrcp.f32 %v688_v17 }
 0x55d   :  { %v927_v20 = vpop.permute.xlu1 %926 }
 0x564   :  { %v3504_v18 = vpop.eup %3503 }
 0x565   :  { %v692_v19 = vmul.f32 %v3504_v18, %v3500_v12 }
 0x567   :  { %3302 = vmatmul.mubr.msk.f32.vlgmr.msra.gmra.mrb[10].mxu1 %vm198_vm2, %v692_v19 }
 0x568   :  { %3310 = vmatpush3.xpose.msk.msra.mxu1 %vm198_vm2, %v927_v20  ;;  %3311 = vmatprep.mubr.msk.f32.mxu1 %vm3688_vm1, %v3687_v8 }
 0x569   :  { %3319 = vmatprep.subr.mxu1 %v3687_v8 }
 0x56b   :  { %3312 = vmatmul.mubr.msk.f32.vlgmr.msra.gmra.mrb[12].mxu1 %vm198_vm2, %v927_v20 }
 0x56c   :  { %3320 = vmatpush3.msra.mxu1 %v927_v20  ;;  %3321 = vmatprep.mubr.msk.f32.mxu1 %vm3688_vm1, %v3687_v8 }
 0x56d   :  { %3329 = vmatprep.subr.mxu1 %v3687_v8 }
 0x5a1   :  { %v3902_v21 = vpop.f32.mrb[4].mxu0 }
 0x5a2   :  { %v3298_v22 = vpop.f32.mrb[5].mxu0 }
 0x5a5   :  { %v922_v26 = vpop.f32.mrb[6].mxu0 }
 0x5a6   :  { %v1002_v27 = vmul.f32 %v1001_v23, %v922_v26  ;;  %v3308_v28 = vpop.f32.mrb[7].mxu0 }
 0x5a7   :  { %v1520_v28 = vld [vmem:[#allocation3] sm:$0xff] }
 0x5a8   :  { %v1004_v29 = vsel %vm198_vm2, %v1002_v27, -inf }
 0x5a9   :  { %1005 = vmax.xlane.f32.xlu1 %v1004_v29  ;;  %v1521_v29 = vld [vmem:[#allocation3 + $0x8] sm:$0xff] }
 0x636   :  { %v1006_v30 = vpop.xlane.xlu1 %1005 }
 0x637   :  { %v1010_v31 = vsub.f32 %v1002_v27, %v1006_v30  ;;  %v3454_v30 = vpack.c.bf16 %v1521_v29, %v1520_v28 }
 0x639   :  { %v1012_v32 = vmul.f32 1.442695, %v1010_v31  ;;  %v1522_v31 = vld [vmem:[#allocation3 + $0x10] sm:$0xff] }
 0x63a   :  { %v3905_v33 = vpop.f32.mrb[10].mxu1 }
 0x63b   :  { %3505 = vpow2.f32 %v1012_v32  ;;  %v3303_v34 = vpop.f32.mrb[11].mxu1  ;;  %v1523_v32 = vld [vmem:[#allocation3 + $0x18] sm:$0xff] }
 0x63e   :  { %v996_v35 = vpop.f32.mrb[12].mxu1 }
 0x63f   :  { %v1003_v36 = vmul.f32 %v1001_v23, %v996_v35  ;;  %v3313_v37 = vpop.f32.mrb[13].mxu1 }
 0x641   :  { %v1007_v38 = vsel %vm198_vm2, %v1003_v36, -inf }
 0x642   :  { %1008 = vmax.xlane.f32.xlu0 %v1007_v38  ;;  %v3138_v38 = vld [vmem:[%s4190_s4] ss:$0 sm:$0xff]  ;;  %s3081_s4 = sshll.u32 %s3694_s18, 4  ;;  %s3082_s4 = int_to_ptr.vmem [resolvable:$true] %s3081_s4 }
 0x643   :  { %s3625_s21 = scalar_lea.vmem %s3082_s4, 256  ;;  %p3630_p13 = scmp.lt.s32.totalorder %s3082_s4, %s3082_s4 }
 0x644   :  { %p3626_p12 = scmp.ne.s32.totalorder %s3082_s4, %s3625_s21  ;;  %p3631_p0 = scmp.lt.s32.totalorder %s3625_s21, %s3625_s21 }
 0x645   :  { %v3506_v39 = vpop.eup %3505 }
 0x646   :  { %v1016_v40 = vsel %vm198_vm2, %v3506_v39, 0.0  ;;  %p3632_p1 = por %p3631_p0, %p3630_p13 }
 0x647   :  { %1017 = vadd.xlane.f32.xlu0 %v1016_v40 }
 0x648   :  { %p3633_p2 = pnand %p3632_p1, %p3626_p12 }
 0x65d   :  { %1185 = vrot.lane.b32.xlu0 %v3826_v24, %s3691_s17 }
 0x6cf   :  { %v1009_v41 = vpop.xlane.xlu0 %1008 }
 0x6d0   :  { %v1011_v42 = vsub.f32 %v1003_v36, %v1009_v41 }
 0x6d2   :  { %v1014_v43 = vmul.f32 1.442695, %v1011_v42 }
 0x6d4   :  { %3507 = vpow2.f32 %v1014_v43  ;;  %v1018_v44 = vpop.xlane.xlu0 %1017 }
 0x6d5   :  { %3509 = vrcp.f32 %v1018_v44 }
 0x6d8   :  { %v1186_v49 = vpop.permute.xlu0 %1185 }
 0x6de   :  { %v3508_v45 = vpop.eup %3507 }
 0x6df   :  { %v3510_v46 = vpop.eup %3509  ;;  %v1019_v47 = vsel %vm198_vm2, %v3508_v45, 0.0 }
 0x6e0   :  { %v1024_v48 = vmul.f32 %v3510_v46, %v3506_v39  ;;  %1020 = vadd.xlane.f32.xlu1 %v1019_v47 }
 0x6e2   :  { %3317 = vmatmul.mubr.msk.f32.vlgmr.msra.gmra.mrb[8].mxu0 %vm198_vm2, %v1024_v48 }
 0x6e3   :  { %3325 = vmatpush3.xpose.msk.msra.mxu0 %vm198_vm2, %v1186_v49  ;;  %3326 = vmatprep.mubr.msk.f32.mxu0 %vm3688_vm1, %v3687_v8 }
 0x6e4   :  { %3334 = vmatprep.subr.mxu0 %v3687_v8 }
 0x6e6   :  { %3327 = vmatmul.mubr.msk.f32.vlgmr.msra.gmra.mrb[10].mxu0 %vm198_vm2, %v1186_v49 }
 0x6e7   :  { %3335 = vmatpush3.msra.mxu0 %v1186_v49  ;;  %3336 = vmatprep.mubr.msk.f32.mxu0 %vm3688_vm1, %v3687_v8 }
 0x6e8   :  { %3455 = vmatprep.subr.bf16.mxu0 %v3454_v30 }
 0x6f1   :  { %1259 = vrot.lane.b32.xlu1 %v3831_v25, %s3691_s17 }
 0x76d   :  { %v1021_v24 = vpop.xlane.xlu1 %1020 }
 0x76e   :  { %3511 = vrcp.f32 %v1021_v24 }
 0x771   :  { %v1260_v52 = vpop.permute.xlu1 %1259 }
 0x778   :  { %v3512_v50 = vpop.eup %3511 }
 0x779   :  { %v1025_v51 = vmul.f32 %v3512_v50, %v3508_v45 }
 0x77b   :  { %3322 = vmatmul.mubr.msk.f32.vlgmr.msra.gmra.mrb[14].mxu1 %vm198_vm2, %v1025_v51 }
 0x77c   :  { %3330 = vmatpush3.xpose.msk.msra.mxu1 %vm198_vm2, %v1260_v52  ;;  %3331 = vmatprep.mubr.msk.f32.mxu1 %vm3688_vm1, %v3687_v8 }
 0x77d   :  { %3339 = vmatprep.subr.mxu1 %v3687_v8 }
 0x77f   :  { %3332 = vmatmul.mubr.msk.f32.vlgmr.msra.gmra.mrb[16].mxu1 %vm198_vm2, %v1260_v52 }
 0x780   :  { %3340 = vmatpush3.msra.mxu1 %v1260_v52  ;;  %3341 = vmatprep.mubr.msk.f32.mxu1 %vm3688_vm1, %v3687_v8 }
 0x781   :  { %3355 = vmatprep.subr.mxu1 %v3687_v8 }
 0x7b5   :  { %v1096_v25 = vpop.f32.mrb[8].mxu0 }
 0x7b6   :  { %v3318_v53 = vpop.f32.mrb[9].mxu0 }
 0x7b9   :  { %v1255_v55 = vpop.f32.mrb[10].mxu0 }
 0x7ba   :  { %v1335_v56 = vmul.f32 %v1334_v54, %v1255_v55  ;;  %v3328_v57 = vpop.f32.mrb[11].mxu0 }
 0x7bc   :  { %v1337_v58 = vsel %vm198_vm2, %v1335_v56, -inf }
 0x7bd   :  { %1338 = vmax.xlane.f32.xlu1 %v1337_v58 }
 0x84a   :  { %v1339_v59 = vpop.xlane.xlu1 %1338 }
 0x84b   :  { %v1343_v60 = vsub.f32 %v1335_v56, %v1339_v59 }
 0x84d   :  { %v1345_v61 = vmul.f32 1.442695, %v1343_v60 }
 0x84e   :  { %v1170_v62 = vpop.f32.mrb[14].mxu1 }
 0x84f   :  { %3513 = vpow2.f32 %v1345_v61  ;;  %v3323_v63 = vpop.f32.mrb[15].mxu1 }
 0x852   :  { %v1329_v0 = vpop.f32.mrb[16].mxu1 }
 0x853   :  { %v1336_v1 = vmul.f32 %v1334_v54, %v1329_v0  ;;  %v3333_v2 = vpop.f32.mrb[17].mxu1 }
 0x855   :  { %v1340_v3 = vsel %vm198_vm2, %v1336_v1, -inf }
 0x856   :  { %1341 = vmax.xlane.f32.xlu0 %v1340_v3 }
 0x859   :  { %v3514_v4 = vpop.eup %3513 }
 0x85a   :  { %v1349_v5 = vsel %vm198_vm2, %v3514_v4, 0.0 }
 0x85b   :  { %1350 = vadd.xlane.f32.xlu0 %v1349_v5 }
 0x871   :  { %843 = vrot.lane.b32.xlu0 %v3902_v21, %s3683_s14 }
 0x8e3   :  { %v1342_v6 = vpop.xlane.xlu0 %1341 }
 0x8e4   :  { %v1344_v7 = vsub.f32 %v1336_v1, %v1342_v6 }
 0x8e6   :  { %v1347_v9 = vmul.f32 1.442695, %v1344_v7 }
 0x8e8   :  { %3515 = vpow2.f32 %v1347_v9  ;;  %v1351_v10 = vpop.xlane.xlu0 %1350 }
 0x8e9   :  { %3517 = vrcp.f32 %v1351_v10 }
 0x8ec   :  { %v844_v11 = vpop.permute.xlu0 %843 }
 0x8ed   :  { %850 = vst.msk [vmem:[#allocation2] sm:$0xff] %vm849_vm3, %v844_v11 }
 0x8f2   :  { %v3516_v12 = vpop.eup %3515 }
 0x8f3   :  { %v3518_v13 = vpop.eup %3517  ;;  %v1352_v14 = vsel %vm198_vm2, %v3516_v12, 0.0 }
 0x8f4   :  { %v1357_v15 = vmul.f32 %v3518_v13, %v3514_v4  ;;  %1353 = vadd.xlane.f32.xlu1 %v1352_v14 }
 0x8f6   :  { %3337 = vmatmul.mubr.msk.f32.vlgmr.msra.gmra.mrb[12].mxu0 %vm198_vm2, %v1357_v15 }
 0x8f7   :  { %3457 = vmatpush3.bf16.msra.mxu0 %v3454_v30 }
 0x905   :  { %845 = vrot.lane.b32.xlu1 %v3905_v33, %s3683_s14  ;;  %v3458_v33 = vpack.c.bf16 %v1523_v32, %v1522_v31 }
 0x907   :  { %3459 = vmatprep.subr.bf16.mxu0 %v3458_v33 }
 0x908   :  { %3461 = vmatpush3.bf16.msra.mxu0 %v3458_v33 }
 0x909   :  { %1176 = vrot.lane.b32.xlu1 %v1096_v25, %s3692_s20  ;;  %3365 = vmatprep.subr.mxu0 %v3687_v8 }
 0x90d   :  { %1178 = vrot.lane.b32.xlu1 %v1170_v62, %s3692_s20 }
 0x981   :  { %v1354_v16 = vpop.xlane.xlu1 %1353 }
 0x982   :  { %3519 = vrcp.f32 %v1354_v16 }
 0x985   :  { %v846_v17 = vpop.permute.xlu1 %845 }
 0x986   :  { %851 = vst.msk [vmem:[#allocation2 + $0x8] sm:$0xff] %vm849_vm3, %v846_v17 }
 0x989   :  { %v1177_v18 = vpop.permute.xlu1 %1176 }
 0x98a   :  { %1183 = vst.msk [vmem:[#allocation2] sm:$0xff] %vm1182_vm4, %v1177_v18 }
 0x98c   :  { %v3520_v19 = vpop.eup %3519 }
 0x98d   :  { %v1358_v20 = vmul.f32 %v3520_v19, %v3516_v12  ;;  %v1179_v21 = vpop.permute.xlu1 %1178  ;;  %v2097_v19 = vstv %s3151_s29 }
 0x98e   :  { %1184 = vst.msk [vmem:[#allocation2 + $0x8] sm:$0xff] %vm1182_vm4, %v1179_v21 }
 0x98f   :  { %3342 = vmatmul.mubr.msk.f32.vlgmr.msra.gmra.mrb[18].mxu1 %vm198_vm2, %v1358_v20 }
 0x990   :  { %3357 = vmatprep.mubr.msk.f32.mxu1 %vm3688_vm1, %v3687_v8 }
 0x9c9   :  { %v1429_v22 = vpop.f32.mrb[12].mxu0 }
 0x9ca   :  { %1509 = vrot.lane.b32.xlu0 %v1429_v22, %s3693_s5  ;;  %v3338_v23 = vpop.f32.mrb[13].mxu0 }
 0xa3c   :  { %v1510_v26 = vpop.permute.xlu0 %1509 }
 0xa3d   :  { %1516 = vst.msk [vmem:[#allocation2] sm:$0xff] %vm1515_vm5, %v1510_v26 }
 0xa44   :  { %v1518_v27 = vld [vmem:[#allocation2] sm:$0xff] }
 0xa45   :  { %3352 = vmatprep.mubr.msk.f32.mxu0 %vm104_vm0, %v1518_v27 }
 0xa62   :  { %v1503_v34 = vpop.f32.mrb[18].mxu1 }
 0xa63   :  { %1511 = vrot.lane.b32.xlu1 %v1503_v34, %s3693_s5  ;;  %v3343_v35 = vpop.f32.mrb[19].mxu1 }
 0xad5   :  { %v1512_v36 = vpop.permute.xlu1 %1511 }
 0xad6   :  { %1517 = vst.msk [vmem:[#allocation2 + $0x8] sm:$0xff] %vm1515_vm5, %v1512_v36 }
 0xadd   :  { %v1519_v37 = vld [vmem:[#allocation2 + $0x8] sm:$0xff] }
 0xade   :  { %3353 = vmatmul.mubr.msk.f32.vlgmr.msra.gmra.mrb[14].mxu0 %vm104_vm0, %v1519_v37 }
 0xadf   :  { %3367 = vmatprep.mubr.msk.f32.mxu0 %vm3688_vm1, %v3687_v8 }
 0xbb1   :  { %v3354_v39 = vpop.f32.mrb[14].mxu0 }
 0xbb2   :  { %v1609_v40 = vadd.f32 %v3354_v39, %v3138_v38  ;;  %v1603_v41 = vpop.f32.mrb[15].mxu0 }
 0xbb3   :  { %v1604_v42 = vadd.f32 %v3138_v38, %v1603_v41 }
 0xbb4   :  { %v1615_v43 = vmul.f32 0.70710677, %v1609_v40  ;;  %v1613_v47 = vmul.f32 0.5, %v1609_v40 }
 0xbb5   :  { %v1614_v44 = vmul.f32 0.70710677, %v1604_v42  ;;  %v1612_v49 = vmul.f32 0.5, %v1604_v42 }
 0xbb6   :  { %3521 = verf.f32 %v1615_v43 }
 0xbb7   :  { %3523 = verf.f32 %v1614_v44 }
 0xbc0   :  { %v3522_v45 = vpop.eup %3521 }
 0xbc1   :  { %v3524_v46 = vpop.eup %3523  ;;  %v1619_v48 = vadd.f32 1.0, %v3522_v45 }
 0xbc2   :  { %v1618_v24 = vadd.f32 1.0, %v3524_v46 }
 0xbc3   :  { %v1621_v50 = vmul.f32 %v1619_v48, %v1613_v47 }
 0xbc4   :  { %v1620_v51 = vmul.f32 %v1618_v24, %v1612_v49 }
 0xbc5   :  { %v3961_v52 = vadd.f32 %v1621_v50, %v1609_v40 }
 0xbc6   :  { %v3963_v25 = vadd.f32 %v1620_v51, %v1604_v42  ;;  %v2437_v51 = vstv %s3158_s3 }
 0xbc7   :  { %1625 = vst.msk [vmem:[%s4198_s12 + $0x8] sm:$0xff] %vm104_vm0, %v3961_v52 }
 0xbc8   :  { %1624 = vst.msk [vmem:[%s4198_s12] sm:$0xff] %vm104_vm0, %v3963_v25  ;;  %3356 = vmatpush3.xpose.msk.msra.mxu1 %vm198_vm2, %v3963_v25  ;;  %3366 = vmatpush3.msra.mxu0 %v3963_v25  ;;  %s1772_s12 = sld [smem:[#allocation10]] }
 0xbc9   :  { %3360 = vmatprep.subr.mxu1 %v3687_v8  ;;  %3375 = vmatprep.subr.mxu0 %v3687_v8 }
 0xbcb   :  { %3358 = vmatmul.mubr.msk.f32.vlgmr.msra.gmra.mrb[20].mxu1 %vm198_vm2, %v3963_v25 }
 0xbcc   :  { %3361 = vmatpush3.xpose.msk.msra.mxu1 %vm198_vm2, %v3961_v52  ;;  %3362 = vmatprep.mubr.msk.f32.mxu1 %vm3688_vm1, %v3687_v8 }
 0xbcd   :  { %3370 = vmatprep.subr.mxu1 %v3687_v8 }
 0xbce   :  { %v1773_v53 = vstv %s1772_s12 }
 0xbcf   :  { %3363 = vmatmul.mubr.msk.f32.vlgmr.msra.gmra.mrb[22].mxu1 %vm198_vm2, %v3961_v52 }
 0xbd0   :  { %3371 = vmatpush3.msra.mxu1 %v3961_v52  ;;  %3372 = vmatprep.mubr.msk.f32.mxu1 %vm3688_vm1, %v3687_v8 }
 0xbd1   :  { %3380 = vmatprep.subr.mxu1 %v3687_v8 }
 0xc9e   :  { %v1695_v54 = vpop.f32.mrb[20].mxu1 }
 0xc9f   :  { %v1774_v55 = vmul.f32 %v1773_v53, %v1695_v54  ;;  %v3359_v56 = vpop.f32.mrb[21].mxu1 }
 0xca1   :  { %v1776_v57 = vsel %vm198_vm2, %v1774_v55, -inf }
 0xca2   :  { %1777 = vmax.xlane.f32.xlu0 %v1776_v57  ;;  %v1768_v58 = vpop.f32.mrb[22].mxu1 }
 0xca3   :  { %v1775_v59 = vmul.f32 %v1773_v53, %v1768_v58  ;;  %v3364_v60 = vpop.f32.mrb[23].mxu1 }
 0xca5   :  { %v1779_v61 = vsel %vm198_vm2, %v1775_v59, -inf }
 0xca6   :  { %1780 = vmax.xlane.f32.xlu1 %v1779_v61 }
 0xcb7   :  { %2022 = vrot.lane.b32.xlu1 %v3961_v52, %s3689_s2 }
 0xd2f   :  { %v1778_v62 = vpop.xlane.xlu0 %1777 }
 0xd30   :  { %v1782_v63 = vsub.f32 %v1774_v55, %v1778_v62 }
 0xd32   :  { %v1784_v0 = vmul.f32 1.442695, %v1782_v63 }
 0xd33   :  { %v1781_v1 = vpop.xlane.xlu1 %1780 }
 0xd34   :  { %3525 = vpow2.f32 %v1784_v0  ;;  %v1783_v2 = vsub.f32 %v1775_v59, %v1781_v1 }
 0xd36   :  { %v1786_v3 = vmul.f32 1.442695, %v1783_v2 }
 0xd37   :  { %v2023_v16 = vpop.permute.xlu1 %2022 }
 0xd38   :  { %3527 = vpow2.f32 %v1786_v3 }
 0xd3e   :  { %v3526_v4 = vpop.eup %3525 }
 0xd3f   :  { %v1788_v5 = vsel %vm198_vm2, %v3526_v4, 0.0 }
 0xd40   :  { %1789 = vadd.xlane.f32.xlu0 %v1788_v5 }
 0xd42   :  { %v3528_v6 = vpop.eup %3527 }
 0xd43   :  { %v1791_v7 = vsel %vm198_vm2, %v3528_v6, 0.0 }
 0xd44   :  { %1792 = vadd.xlane.f32.xlu0 %v1791_v7 }
 0xd5a   :  { %1948 = vrot.lane.b32.xlu0 %v3963_v25, %s3689_s2 }
 0xdcd   :  { %v1790_v9 = vpop.xlane.xlu0 %1789 }
 0xdce   :  { %3529 = vrcp.f32 %v1790_v9 }
 0xdd1   :  { %v1793_v10 = vpop.xlane.xlu0 %1792 }
 0xdd2   :  { %3531 = vrcp.f32 %v1793_v10 }
 0xdd5   :  { %v1949_v13 = vpop.permute.xlu0 %1948 }
 0xdd8   :  { %v3530_v11 = vpop.eup %3529 }
 0xdd9   :  { %v1796_v12 = vmul.f32 %v3530_v11, %v3526_v4 }
 0xddb   :  { %1946 = vst.msk [vmem:[%s4197_s11] sm:$0xff] %vm198_vm2, %v1796_v12  ;;  %3368 = vmatmul.mubr.msk.f32.vlgmr.msra.gmra.mrb[16].mxu0 %vm198_vm2, %v1796_v12 }
 0xddc   :  { %v3532_v14 = vpop.eup %3531  ;;  %3376 = vmatpush3.xpose.msk.msra.mxu0 %vm198_vm2, %v1949_v13  ;;  %3377 = vmatprep.mubr.msk.f32.mxu0 %vm3688_vm1, %v3687_v8 }
 0xddd   :  { %v1797_v15 = vmul.f32 %v3532_v14, %v3528_v6  ;;  %3385 = vmatprep.subr.mxu0 %v3687_v8 }
 0xddf   :  { %1947 = vst.msk [vmem:[%s4197_s11 + $0x8] sm:$0xff] %vm198_vm2, %v1797_v15  ;;  %3373 = vmatmul.mubr.msk.f32.vlgmr.msra.gmra.mrb[24].mxu1 %vm198_vm2, %v1797_v15  ;;  %3378 = vmatmul.mubr.msk.f32.vlgmr.msra.gmra.mrb[18].mxu0 %vm198_vm2, %v1949_v13 }
 0xde0   :  { %3381 = vmatpush3.xpose.msk.msra.mxu1 %vm198_vm2, %v2023_v16  ;;  %3386 = vmatpush3.msra.mxu0 %v1949_v13 }
 0xde1   :  { %3382 = vmatprep.mubr.msk.f32.mxu1 %vm3688_vm1, %v3687_v8  ;;  %3390 = vmatprep.subr.mxu1 %v3687_v8 }
 0xde2   :  { %3387 = vmatprep.mubr.msk.f32.mxu0 %vm3688_vm1, %v3687_v8  ;;  %3395 = vmatprep.subr.mxu0 %v3687_v8 }
 0xde3   :  { %3383 = vmatmul.mubr.msk.f32.vlgmr.msra.gmra.mrb[26].mxu1 %vm198_vm2, %v2023_v16 }
 0xde4   :  { %3391 = vmatpush3.msra.mxu1 %v2023_v16  ;;  %3392 = vmatprep.mubr.msk.f32.mxu1 %vm3688_vm1, %v3687_v8 }
 0xde5   :  { %3400 = vmatprep.subr.mxu1 %v3687_v8 }
 0xeae   :  { %v1867_v17 = vpop.f32.mrb[16].mxu0 }
 0xeaf   :  { %1944 = vst.msk [vmem:[#allocation13] sm:$0xff] %vm198_vm2, %v1867_v17  ;;  %v3369_v18 = vpop.f32.mrb[17].mxu0 }
 0xeb0   :  { %v2777_v18 = vstv %s3165_s7 }
 0xeb2   :  { %v1940_v20 = vpop.f32.mrb[24].mxu1  ;;  %v2018_v21 = vpop.f32.mrb[18].mxu0 }
 0xeb3   :  { %1945 = vst.msk [vmem:[#allocation13 + $0x8] sm:$0xff] %vm198_vm2, %v1940_v20  ;;  %v2098_v22 = vmul.f32 %v2097_v19, %v2018_v21  ;;  %v3374_v23 = vpop.f32.mrb[25].mxu1  ;;  %v3379_v26 = vpop.f32.mrb[19].mxu0 }
 0xeb5   :  { %v2100_v27 = vsel %vm198_vm2, %v2098_v22, -inf }
 0xeb6   :  { %2101 = vmax.xlane.f32.xlu1 %v2100_v27  ;;  %v2092_v28 = vpop.f32.mrb[26].mxu1 }
 0xeb7   :  { %v2099_v29 = vmul.f32 %v2097_v19, %v2092_v28  ;;  %v3384_v30 = vpop.f32.mrb[27].mxu1 }
 0xeb9   :  { %v2103_v31 = vsel %vm198_vm2, %v2099_v29, -inf }
 0xeba   :  { %2104 = vmax.xlane.f32.xlu0 %v2103_v31 }
 0xf43   :  { %v2102_v32 = vpop.xlane.xlu1 %2101 }
 0xf44   :  { %v2106_v33 = vsub.f32 %v2098_v22, %v2102_v32 }
 0xf46   :  { %v2108_v34 = vmul.f32 1.442695, %v2106_v33 }
 0xf47   :  { %v2105_v35 = vpop.xlane.xlu0 %2104 }
 0xf48   :  { %3533 = vpow2.f32 %v2108_v34  ;;  %v2107_v36 = vsub.f32 %v2099_v29, %v2105_v35 }
 0xf4a   :  { %v2110_v37 = vmul.f32 1.442695, %v2107_v36 }
 0xf4c   :  { %3535 = vpow2.f32 %v2110_v37 }
 0xf52   :  { %v3534_v38 = vpop.eup %3533 }
 0xf53   :  { %v2112_v39 = vsel %vm198_vm2, %v3534_v38, 0.0 }
 0xf54   :  { %2113 = vadd.xlane.f32.xlu0 %v2112_v39 }
 0xf56   :  { %v3536_v40 = vpop.eup %3535 }
 0xf57   :  { %v2115_v41 = vsel %vm198_vm2, %v3536_v40, 0.0 }
 0xf58   :  { %2116 = vadd.xlane.f32.xlu1 %v2115_v41 }
 0xf69   :  { %2362 = vrot.lane.b32.xlu1 %v3961_v52, %s3690_s15 }
 0xf6a   :  { %2288 = vrot.lane.b32.xlu0 %v3963_v25, %s3690_s15 }
 0xfe1   :  { %v2114_v42 = vpop.xlane.xlu0 %2113 }
 0xfe2   :  { %3537 = vrcp.f32 %v2114_v42 }
 0xfe5   :  { %v2117_v43 = vpop.xlane.xlu1 %2116  ;;  %v2289_v46 = vpop.permute.xlu0 %2288 }
 0xfe6   :  { %3539 = vrcp.f32 %v2117_v43 }
 0xfe9   :  { %v2363_v49 = vpop.permute.xlu1 %2362 }
 0xfec   :  { %v3538_v44 = vpop.eup %3537 }
 0xfed   :  { %v4037_v45 = vmul.f32 %v3538_v44, %v3534_v38 }
 0xfef   :  { %3388 = vmatmul.mubr.msk.f32.vlgmr.msra.gmra.mrb[20].mxu0 %vm198_vm2, %v4037_v45 }
 0xff0   :  { %v3540_v47 = vpop.eup %3539  ;;  %3396 = vmatpush3.xpose.msk.msra.mxu0 %vm198_vm2, %v2289_v46  ;;  %3397 = vmatprep.mubr.msk.f32.mxu0 %vm3688_vm1, %v3687_v8 }
 0xff1   :  { %v4044_v48 = vmul.f32 %v3540_v47, %v3536_v40  ;;  %3405 = vmatprep.subr.mxu0 %v3687_v8 }
 0xff3   :  { %3393 = vmatmul.mubr.msk.f32.vlgmr.msra.gmra.mrb[28].mxu1 %vm198_vm2, %v4044_v48  ;;  %3398 = vmatmul.mubr.msk.f32.vlgmr.msra.gmra.mrb[22].mxu0 %vm198_vm2, %v2289_v46 }
 0xff4   :  { %3401 = vmatpush3.xpose.msk.msra.mxu1 %vm198_vm2, %v2363_v49  ;;  %3406 = vmatpush3.msra.mxu0 %v2289_v46 }
 0xff5   :  { %3402 = vmatprep.mubr.msk.f32.mxu1 %vm3688_vm1, %v3687_v8  ;;  %3410 = vmatprep.subr.mxu1 %v3687_v8 }
 0xff6   :  { %3407 = vmatprep.mubr.msk.f32.mxu0 %vm3688_vm1, %v3687_v8  ;;  %3415 = vmatprep.subr.mxu0 %v3687_v8 }
 0xff7   :  { %3403 = vmatmul.mubr.msk.f32.vlgmr.msra.gmra.mrb[30].mxu1 %vm198_vm2, %v2363_v49 }
 0xff8   :  { %3411 = vmatpush3.msra.mxu1 %v2363_v49  ;;  %3412 = vmatprep.mubr.msk.f32.mxu1 %vm3688_vm1, %v3687_v8 }
 0xff9   :  { %3420 = vmatprep.subr.mxu1 %v3687_v8 }
0x10c2   :  { %v4061_v24 = vpop.f32.mrb[20].mxu0 }
0x10c3   :  { %v3389_v50 = vpop.f32.mrb[21].mxu0 }
0x10c6   :  { %v4063_v53 = vpop.f32.mrb[28].mxu1  ;;  %v2358_v54 = vpop.f32.mrb[22].mxu0 }
0x10c7   :  { %v2438_v55 = vmul.f32 %v2437_v51, %v2358_v54  ;;  %v3394_v56 = vpop.f32.mrb[29].mxu1  ;;  %v3399_v57 = vpop.f32.mrb[23].mxu0 }
0x10c8   :  { %v2973_v56 = vld [vmem:[#allocation7 + $0x18] sm:$0xff] }
0x10c9   :  { %v2440_v58 = vsel %vm198_vm2, %v2438_v55, -inf }
0x10ca   :  { %2441 = vmax.xlane.f32.xlu1 %v2440_v58  ;;  %v2432_v59 = vpop.f32.mrb[30].mxu1 }
0x10cb   :  { %v2439_v60 = vmul.f32 %v2437_v51, %v2432_v59  ;;  %v3404_v61 = vpop.f32.mrb[31].mxu1  ;;  %v2970_v51 = vld [vmem:[#allocation7] sm:$0xff] }
0x10cd   :  { %v2443_v62 = vsel %vm198_vm2, %v2439_v60, -inf }
0x10ce   :  { %2444 = vmax.xlane.f32.xlu0 %v2443_v62 }
0x1157   :  { %v2442_v63 = vpop.xlane.xlu1 %2441 }
0x1158   :  { %v2446_v0 = vsub.f32 %v2438_v55, %v2442_v63  ;;  %v2972_v55 = vld [vmem:[#allocation7 + $0x10] sm:$0xff] }
0x1159   :  { %v3466_v57 = vpack.c.bf16 %v2973_v56, %v2972_v55 }
0x115a   :  { %v2448_v1 = vmul.f32 1.442695, %v2446_v0 }
0x115b   :  { %v2445_v2 = vpop.xlane.xlu0 %2444 }
0x115c   :  { %3541 = vpow2.f32 %v2448_v1  ;;  %v2447_v3 = vsub.f32 %v2439_v60, %v2445_v2 }
0x115e   :  { %v2450_v4 = vmul.f32 1.442695, %v2447_v3 }
0x1160   :  { %3543 = vpow2.f32 %v2450_v4 }
0x1166   :  { %v3542_v5 = vpop.eup %3541 }
0x1167   :  { %v2452_v6 = vsel %vm198_vm2, %v3542_v5, 0.0 }
0x1168   :  { %2453 = vadd.xlane.f32.xlu0 %v2452_v6 }
0x116a   :  { %v3544_v7 = vpop.eup %3543 }
0x116b   :  { %v2455_v9 = vsel %vm198_vm2, %v3544_v7, 0.0 }
0x116c   :  { %2456 = vadd.xlane.f32.xlu1 %v2455_v9 }
0x117d   :  { %2702 = vrot.lane.b32.xlu1 %v3961_v52, %s3691_s17 }
0x117e   :  { %2628 = vrot.lane.b32.xlu0 %v3963_v25, %s3691_s17 }
0x11f5   :  { %v2454_v10 = vpop.xlane.xlu0 %2453 }
0x11f6   :  { %3545 = vrcp.f32 %v2454_v10 }
0x11f9   :  { %v2457_v11 = vpop.xlane.xlu1 %2456  ;;  %v2629_v14 = vpop.permute.xlu0 %2628 }
0x11fa   :  { %3547 = vrcp.f32 %v2457_v11 }
0x11fd   :  { %v2703_v25 = vpop.permute.xlu1 %2702 }
0x1200   :  { %v3546_v12 = vpop.eup %3545 }
0x1201   :  { %v4073_v13 = vmul.f32 %v3546_v12, %v3542_v5 }
0x1203   :  { %3408 = vmatmul.mubr.msk.f32.vlgmr.msra.gmra.mrb[24].mxu0 %vm198_vm2, %v4073_v13 }
0x1204   :  { %v3548_v15 = vpop.eup %3547  ;;  %3416 = vmatpush3.xpose.msk.msra.mxu0 %vm198_vm2, %v2629_v14  ;;  %3417 = vmatprep.mubr.msk.f32.mxu0 %vm3688_vm1, %v3687_v8 }
0x1205   :  { %v4080_v52 = vmul.f32 %v3548_v15, %v3544_v7  ;;  %3425 = vmatprep.subr.mxu0 %v3687_v8 }
0x1207   :  { %3413 = vmatmul.mubr.msk.f32.vlgmr.msra.gmra.mrb[32].mxu1 %vm198_vm2, %v4080_v52  ;;  %3418 = vmatmul.mubr.msk.f32.vlgmr.msra.gmra.mrb[26].mxu0 %vm198_vm2, %v2629_v14 }
0x1208   :  { %3421 = vmatpush3.xpose.msk.msra.mxu1 %vm198_vm2, %v2703_v25  ;;  %3426 = vmatpush3.msra.mxu0 %v2629_v14 }
0x1209   :  { %3422 = vmatprep.mubr.msk.f32.mxu1 %vm3688_vm1, %v3687_v8  ;;  %3430 = vmatprep.subr.mxu1 %v3687_v8 }
0x120a   :  { %3427 = vmatprep.mubr.msk.f32.mxu0 %vm3688_vm1, %v3687_v8 }
0x120b   :  { %3423 = vmatmul.mubr.msk.f32.vlgmr.msra.gmra.mrb[34].mxu1 %vm198_vm2, %v2703_v25 }
0x120c   :  { %3431 = vmatpush3.msra.mxu1 %v2703_v25  ;;  %3432 = vmatprep.mubr.msk.f32.mxu1 %vm3688_vm1, %v3687_v8 }
0x12d6   :  { %v2532_v16 = vpop.f32.mrb[24].mxu0 }
0x12d7   :  { %v3409_v17 = vpop.f32.mrb[25].mxu0 }
0x12da   :  { %v2606_v19 = vpop.f32.mrb[32].mxu1  ;;  %v2698_v20 = vpop.f32.mrb[26].mxu0 }
0x12db   :  { %v2778_v21 = vmul.f32 %v2777_v18, %v2698_v20  ;;  %v3414_v22 = vpop.f32.mrb[33].mxu1  ;;  %v3419_v23 = vpop.f32.mrb[27].mxu0 }
0x12dd   :  { %v2780_v26 = vsel %vm198_vm2, %v2778_v21, -inf }
0x12de   :  { %2781 = vmax.xlane.f32.xlu1 %v2780_v26  ;;  %v2772_v27 = vpop.f32.mrb[34].mxu1 }
0x12df   :  { %v2779_v28 = vmul.f32 %v2777_v18, %v2772_v27  ;;  %v3424_v29 = vpop.f32.mrb[35].mxu1 }
0x12e1   :  { %v2783_v30 = vsel %vm198_vm2, %v2779_v28, -inf }
0x12e2   :  { %2784 = vmax.xlane.f32.xlu0 %v2783_v30 }
0x136b   :  { %v2782_v31 = vpop.xlane.xlu1 %2781 }
0x136c   :  { %v2786_v8 = vsub.f32 %v2778_v21, %v2782_v31 }
0x136e   :  { %v2788_v32 = vmul.f32 1.442695, %v2786_v8 }
0x136f   :  { %v2785_v33 = vpop.xlane.xlu0 %2784 }
0x1370   :  { %3549 = vpow2.f32 %v2788_v32  ;;  %v2787_v34 = vsub.f32 %v2779_v28, %v2785_v33 }
0x1372   :  { %v2790_v35 = vmul.f32 1.442695, %v2787_v34 }
0x1374   :  { %3551 = vpow2.f32 %v2790_v35 }
0x137a   :  { %v3550_v36 = vpop.eup %3549 }
0x137b   :  { %v2792_v37 = vsel %vm198_vm2, %v3550_v36, 0.0 }
0x137c   :  { %2793 = vadd.xlane.f32.xlu0 %v2792_v37 }
0x137e   :  { %v3552_v38 = vpop.eup %3551 }
0x137f   :  { %v2795_v39 = vsel %vm198_vm2, %v3552_v38, 0.0 }
0x1380   :  { %2796 = vadd.xlane.f32.xlu1 %v2795_v39 }
0x1391   :  { %2274 = vrot.lane.b32.xlu1 %v4063_v53, %s3683_s14  ;;  %v2971_v53 = vld [vmem:[#allocation7 + $0x8] sm:$0xff] }
0x1392   :  { %2272 = vrot.lane.b32.xlu0 %v4061_v24, %s3683_s14  ;;  %v3462_v54 = vpack.c.bf16 %v2971_v53, %v2970_v51 }
0x1394   :  { %3463 = vmatprep.subr.bf16.mxu0 %v3462_v54 }
0x1395   :  { %2612 = vrot.lane.b32.xlu1 %v2532_v16, %s3692_s20 }
0x1399   :  { %2614 = vrot.lane.b32.xlu1 %v2606_v19, %s3692_s20 }
0x1409   :  { %v2794_v40 = vpop.xlane.xlu0 %2793 }
0x140a   :  { %3553 = vrcp.f32 %v2794_v40 }
0x140d   :  { %v2797_v41 = vpop.xlane.xlu1 %2796  ;;  %v2273_v42 = vpop.permute.xlu0 %2272 }
0x140e   :  { %3555 = vrcp.f32 %v2797_v41  ;;  %2278 = vst.msk [vmem:[#allocation13] sm:$0xff] %vm849_vm3, %v2273_v42 }
0x1411   :  { %v2275_v43 = vpop.permute.xlu1 %2274 }
0x1412   :  { %2279 = vst.msk [vmem:[#allocation13 + $0x8] sm:$0xff] %vm849_vm3, %v2275_v43 }
0x1414   :  { %v3554_v44 = vpop.eup %3553 }
0x1415   :  { %v2800_v46 = vmul.f32 %v3554_v44, %v3550_v36  ;;  %v2613_v47 = vpop.permute.xlu1 %2612 }
0x1416   :  { %2618 = vst.msk [vmem:[#allocation13] sm:$0xff] %vm1182_vm4, %v2613_v47 }
0x1417   :  { %3428 = vmatmul.mubr.msk.f32.vlgmr.msra.gmra.mrb[28].mxu0 %vm198_vm2, %v2800_v46 }
0x1418   :  { %v3556_v49 = vpop.eup %3555  ;;  %3465 = vmatpush3.bf16.msra.mxu0 %v3462_v54 }
0x1419   :  { %v2801_v24 = vmul.f32 %v3556_v49, %v3552_v38  ;;  %v2615_v50 = vpop.permute.xlu1 %2614  ;;  %3467 = vmatprep.subr.bf16.mxu0 %v3466_v57 }
0x141a   :  { %2619 = vst.msk [vmem:[#allocation13 + $0x8] sm:$0xff] %vm1182_vm4, %v2615_v50 }
0x141b   :  { %3433 = vmatmul.mubr.msk.f32.vlgmr.msra.gmra.mrb[36].mxu1 %vm198_vm2, %v2801_v24 }
0x141c   :  { %3469 = vmatpush3.bf16.msra.mxu0 %v3466_v57 }
0x14ea   :  { %v2872_v58 = vpop.f32.mrb[28].mxu0 }
0x14eb   :  { %2952 = vrot.lane.b32.xlu0 %v2872_v58, %s3693_s5  ;;  %v3429_v59 = vpop.f32.mrb[29].mxu0 }
0x14ee   :  { %v2946_v60 = vpop.f32.mrb[36].mxu1 }
0x14ef   :  { %2280 = vrot.lane.b32.xlu0 %v4037_v45, %s3683_s14  ;;  %2954 = vrot.lane.b32.xlu1 %v2946_v60, %s3693_s5  ;;  %v3434_v61 = vpop.f32.mrb[37].mxu1 }
0x14f3   :  { %2620 = vrot.lane.b32.xlu0 %v4073_v13, %s3692_s20  ;;  %2282 = vrot.lane.b32.xlu1 %v4044_v48, %s3683_s14 }
0x14f7   :  { %2960 = vrot.lane.b32.xlu0 %v2800_v46, %s3693_s5  ;;  %2622 = vrot.lane.b32.xlu1 %v4080_v52, %s3692_s20 }
0x14fb   :  { %2962 = vrot.lane.b32.xlu1 %v2801_v24, %s3693_s5 }
0x155d   :  { %v2953_v62 = vpop.permute.xlu0 %2952 }
0x155e   :  { %2958 = vst.msk [vmem:[#allocation13] sm:$0xff] %vm1515_vm5, %v2953_v62 }
0x1561   :  { %v2281_v45 = vpop.permute.xlu0 %2280  ;;  %v2955_v63 = vpop.permute.xlu1 %2954 }
0x1562   :  { %2286 = vst.msk [vmem:[%s4197_s11] sm:$0xff] %vm849_vm3, %v2281_v45 }
0x1563   :  { %2959 = vst.msk [vmem:[#allocation13 + $0x8] sm:$0xff] %vm1515_vm5, %v2955_v63 }
0x1565   :  { %v2621_v48 = vpop.permute.xlu0 %2620  ;;  %v2283_v0 = vpop.permute.xlu1 %2282  ;;  %v2968_v1 = vld [vmem:[#allocation13] sm:$0xff] }
0x1566   :  { %2626 = vst.msk [vmem:[%s4197_s11] sm:$0xff] %vm1182_vm4, %v2621_v48  ;;  %3443 = vmatprep.mubr.msk.f32.mxu0 %vm104_vm0, %v2968_v1 }
0x1567   :  { %2287 = vst.msk [vmem:[%s4197_s11 + $0x8] sm:$0xff] %vm849_vm3, %v2283_v0 }
0x1569   :  { %v2961_v2 = vpop.permute.xlu0 %2960  ;;  %v2623_v3 = vpop.permute.xlu1 %2622 }
0x156a   :  { %v2969_v4 = vld [vmem:[#allocation13 + $0x8] sm:$0xff]  ;;  %2966 = vst.msk [vmem:[%s4197_s11] sm:$0xff] %vm1515_vm5, %v2961_v2 }
0x156b   :  { %2627 = vst.msk [vmem:[%s4197_s11 + $0x8] sm:$0xff] %vm1182_vm4, %v2623_v3  ;;  %3444 = vmatmul.mubr.msk.f32.vlgmr.msra.gmra.mrb[30].mxu0 %vm104_vm0, %v2969_v4 }
0x156d   :  { %v2963_v5 = vpop.permute.xlu1 %2962 }
0x156e   :  { %2967 = vst.msk [vmem:[%s4197_s11 + $0x8] sm:$0xff] %vm1515_vm5, %v2963_v5 }
0x156f   :  { %3636 = shalt.err (!%p3633_p2)
}
0x1570   :  { %s3637_s12 = scalar_lea.hbm %s4196_s10, 256 }
0x1571   :  { %p3638_p3 = scmp.ne.s32.totalorder %s4196_s10, %s3637_s12  ;;  %p3641_p4 = scmp.lt.u32.totalorder %s3637_s12, %s4196_s10 }
0x1573   :  { %p3643_p5 = pnand %p3641_p4, %p3638_p3 }
0x1575   :  { %3646 = shalt.err (!%p3643_p5)
}
0x1576   :  { %3087 = dma.vmem_to_hbm [thread:$0]  %s3082_s4, 256, %s4196_s10, [#allocation14], %s3682_s13, %s3682_s13, %s3683_s14  }
0x1577   :  { %v3168_v6 = vld [vmem:[%s4192_s6] ss:$0 sm:$0xff]  ;;  %s3695_s1 = smov [#allocation12]  }
0x1578   :  { %s3069_s22 = sshll.u32 %s3695_s1, 4  ;;  %s3070_s22 = int_to_ptr.vmem [resolvable:$true] %s3069_s22 }
0x1579   :  { %s3647_s0 = scalar_lea.vmem %s3070_s22, 256  ;;  %p3652_p7 = scmp.lt.s32.totalorder %s3070_s22, %s3070_s22 }
0x157a   :  { %p3648_p6 = scmp.ne.s32.totalorder %s3070_s22, %s3647_s0  ;;  %p3653_p8 = scmp.lt.s32.totalorder %s3647_s0, %s3647_s0 }
0x157c   :  { %p3654_p9 = por %p3653_p8, %p3652_p7 }
0x157e   :  { %p3655_p10 = pnand %p3654_p9, %p3648_p6 }
0x163e   :  { %v3445_v7 = vpop.f32.mrb[30].mxu0 }
0x163f   :  { %v3059_v9 = vadd.f32 %v3445_v7, %v3168_v6  ;;  %v3053_v10 = vpop.f32.mrb[31].mxu0 }
0x1640   :  { %v3054_v11 = vadd.f32 %v3168_v6, %v3053_v10 }
0x1641   :  { %3063 = vst.msk [vmem:[#allocation12 + $0x8] sm:$0xff] %vm104_vm0, %v3059_v9 }
0x1642   :  { %3062 = vst.msk [vmem:[#allocation12] sm:$0xff] %vm104_vm0, %v3054_v11 }
0x1643   :  { %3658 = shalt.err (!%p3655_p10)
}
0x1644   :  { %s3659_s2 = scalar_lea.hbm %s4195_s9, 256 }
0x1645   :  { %p3660_p11 = scmp.ne.s32.totalorder %s4195_s9, %s3659_s2  ;;  %p3663_p12 = scmp.lt.u32.totalorder %s3659_s2, %s4195_s9 }
0x1647   :  { %p3665_p13 = pnand %p3663_p12, %p3660_p11 }
0x1649   :  { %3668 = shalt.err (!%p3665_p13)
}
0x164a   :  { %3075 = dma.vmem_to_hbm [thread:$0]  %s3070_s22, 256, %s4195_s9, [#allocation5], %s3682_s13, %s3682_s13, %s3683_s14  }
0x164b   :  { %3677 = dma.done.wait [#allocation5], 256  }
0x164c   :  { %3678 = vsyncadd [#allocation5], 4294967040 }
0x164d   :  { %3679 = dma.done.wait [#allocation14], 256  }
0x164e   :  { %3680 = vsyncadd [#allocation14], 4294967040 }
0x164f   :  { %3102 = vsyncpa [#allocation4], 1 }
0x1650   :  { %3103 = vsyncpa [#allocation8], 1 }
0x1651   :  { %3104 = vsyncpa [#allocation5], 1 }
0x1652   :  { %3105 = vsyncpa [#allocation14], 1 }
0x1653   :  { %3106 = vsyncpa [#allocation6], 1 }
0x1654   :  { %3107 = vsyncpa [#allocation11], 1 }

</bundles_post_ra>
